<compile_context>
chip_gen: v7x
topology: tpu7x:2x2x1
jax: 0.10.0
libtpu: 0.0.40
codegen_flags: <defaults>
</compile_context>

<pallas_src>
import functools
import math

import jax
import jax.numpy as jnp
from jax.experimental import pallas as pl
from jax.experimental.pallas import tpu as pltpu


def _cma_flash_kernel(*refs, cross_value: bool, needs_mask: bool):
    it = iter(refs)
    gamma_ref = next(it)          # SMEM (1, 1)
    x_ref = next(it)              # (1, tq, C) f32   (query source + residual)
    y_ref = next(it)              # (1, tk, C) bf16  (key source)
    v_ref = y_ref if cross_value else next(it)   # value source, key-indexed
    kbias_ref = next(it) if needs_mask else None  # (1, tk) f32 additive bias
    wqk_ref = next(it)            # (C, C) bf16  = Wq^T Wk
    bkq_ref = next(it)            # (1, C) f32   = Wk^T bq
    wvt_ref = next(it)            # (C, C) bf16  = Wv^T
    bv_ref = next(it)             # (1, C) f32
    o_ref = next(it)              # (1, tq, C) f32
    qeff_sc = next(it)            # (tq, C) bf16 cached effective queries
    m_sc = next(it)               # (tq, 1) f32 running max
    l_sc = next(it)               # (tq, 1) f32 running denom
    acc_sc = next(it)             # (tq, C) f32 attn @ value accumulator

    ki = pl.program_id(2)
    nk = pl.num_programs(2)

    @pl.when(ki == 0)
    def _init():
        # Effective queries for this q tile, cached across all key tiles.
        xq = x_ref[0].astype(jnp.bfloat16)                        # (tq, C)
        qeff = jnp.dot(xq, wqk_ref[...],
                       preferred_element_type=jnp.float32) + bkq_ref[...]
        qeff_sc[...] = qeff.astype(jnp.bfloat16)
        m_sc[...] = jnp.full(m_sc.shape, -jnp.inf, jnp.float32)
        l_sc[...] = jnp.zeros(l_sc.shape, jnp.float32)
        acc_sc[...] = jnp.zeros(acc_sc.shape, jnp.float32)

    y = y_ref[0]                                                   # (tk, C) bf16
    # energy[i, j] = qeff_i . y_j   (contraction over channels, NT matmul)
    energy = jax.lax.dot_general(
        qeff_sc[...], y, (((1,), (1,)), ((), ())),
        preferred_element_type=jnp.float32)                        # (tq, tk)
    if needs_mask:
        energy = energy + kbias_ref[...]     # additive 0 / -1e30 key bias

    # --- online softmax update ---
    m_prev = m_sc[...]
    m_new = jnp.maximum(m_prev, jnp.max(energy, axis=-1, keepdims=True))
    alpha = jnp.exp(m_prev - m_new)                                # (tq, 1)
    p = jnp.exp(energy - m_new)                                    # (tq, tk) f32
    l_sc[...] = alpha * l_sc[...] + jnp.sum(p, axis=-1, keepdims=True)
    acc_sc[...] = alpha * acc_sc[...] + jnp.dot(
        p.astype(jnp.bfloat16), v_ref[0], preferred_element_type=jnp.float32)
    m_sc[...] = m_new

    @pl.when(ki == nk - 1)
    def _finalize():
        # ctx = softmax(energy) @ value_source   (value projection deferred)
        ctx = acc_sc[...] * pl.reciprocal(l_sc[...], approx=True)  # (tq, C)
        out = jnp.dot(ctx.astype(jnp.bfloat16), wvt_ref[...],
                      preferred_element_type=jnp.float32) + bv_ref[...]
        # f32 output for an exact residual; on v5e a bf16 store halves the
        # dominant output stream if downstream tolerates it.
        o_ref[0] = gamma_ref[0, 0] * out + x_ref[0]
        # TODO(synk): optional `activation` (None by default) would go here.


def cross_modal_attention(x, y, params, cross_value=True, block_q=None,
                          block_k=None, vmem_limit_bytes=None):
    """x, y: (B, C, H, W) float32. Returns (B, C, H, W) float32."""
    wq, bq, wk, bk, wv, bv, gamma = params
    B, C, H, W = x.shape
    N = H * W
    f32 = jnp.float32

    # --- fold Q/K projections (bk terms are per-row softmax constants) ---
    wqk = (wq.astype(f32).T @ wk.astype(f32)).astype(jnp.bfloat16)   # (C, C)
    bkq = (wk.astype(f32).T @ bq.astype(f32)).reshape(1, C)          # (1, C)
    wvt = wv.astype(f32).T.astype(jnp.bfloat16)                      # (C, C)
    bv2 = bv.astype(f32).reshape(1, C)
    gamma_arr = jnp.asarray(gamma, f32).reshape(1, 1)

    # --- tiling: decoupled q/k tiles, all multiples of 128 ---
    def rup(a, m):
        return ((a + m - 1) // m) * m

    n128 = rup(N, 128)
    tq = min(rup(block_q or 512, 128), n128)
    tk = min(rup(block_k or 256, 128), n128)
    # v7x megacore: with B == 1 keep >= 2 parallel q tiles so both TCs work.
    if B == 1 and n128 >= 256:
        tq = min(tq, (n128 // 2) // 128 * 128)
    n_pad = rup(N, (tq * tk) // math.gcd(tq, tk))
    nq_tiles, nk_tiles = n_pad // tq, n_pad // tk
    needs_mask = n_pad != N

    if vmem_limit_bytes is None:
        try:
            cap = int(getattr(pltpu.get_tpu_info(), "vmem_capacity_bytes",
                              128 * 1024 * 1024))
        except Exception:  # pragma: no cover - trace-time query best effort
            cap = 128 * 1024 * 1024
        # ~96 MiB on v5e/v6e (128 MiB VMEM), ~56 MiB on v7x (64 MiB VMEM).
        vmem_limit_bytes = min(96 * 1024 * 1024, cap - 8 * 1024 * 1024)

    def to_nc(t, dtype):
        # NCHW -> (B, N, C) with channels on the lane axis, padded along N.
        t = jnp.transpose(t.reshape(B, C, N), (0, 2, 1)).astype(dtype)
        if needs_mask:
            t = jnp.pad(t, ((0, 0), (0, n_pad - N), (0, 0)))
        return t

    x_nc = to_nc(x, f32)              # f32: used for the exact residual add
    y_nc = to_nc(y, jnp.bfloat16)     # bf16: matmul-only -> half the DMA bytes

    q_spec = pl.BlockSpec((1, tq, C), lambda b, qi, ki: (b, qi, 0))
    k_spec = pl.BlockSpec((1, tk, C), lambda b, qi, ki: (b, ki, 0))

    def const_spec(shape):
        # Constant index_map -> single-buffer (double-buffering is wasted VMEM).
        return pl.BlockSpec(shape, lambda b, qi, ki: (0,) * len(shape),
                            pipeline_mode=pl.Buffered(1))

    inputs = [gamma_arr, x_nc, y_nc]
    in_specs = [pl.BlockSpec(memory_space=pltpu.MemorySpace.SMEM), q_spec, k_spec]
    if not cross_value:
        inputs.append(to_nc(x, jnp.bfloat16))      # value source = x, key-indexed
        in_specs.append(k_spec)
    if needs_mask:
        col = jnp.arange(n_pad, dtype=jnp.int32)
        kbias = jnp.where(col < N, 0.0, -1e30).astype(f32).reshape(1, n_pad)
        inputs.append(kbias)
        in_specs.append(pl.BlockSpec((1, tk), lambda b, qi, ki: (0, ki)))
    inputs += [wqk, bkq, wvt, bv2]
    in_specs += [const_spec((C, C)), const_spec((1, C)),
                 const_spec((C, C)), const_spec((1, C))]

    kernel = functools.partial(_cma_flash_kernel, cross_value=cross_value,
                               needs_mask=needs_mask)

    out_nc = pl.pallas_call(
        kernel,
        out_shape=jax.ShapeDtypeStruct((B, n_pad, C), f32),
        grid_spec=pltpu.PrefetchScalarGridSpec(
            num_scalar_prefetch=0,
            grid=(B, nq_tiles, nk_tiles),
            in_specs=in_specs,
            out_specs=pl.BlockSpec((1, tq, C), lambda b, qi, ki: (b, qi, 0)),
            scratch_shapes=[
                pltpu.VMEM((tq, C), jnp.bfloat16),   # cached effective queries
                pltpu.VMEM((tq, 1), jnp.float32),    # running max
                pltpu.VMEM((tq, 1), jnp.float32),    # running denom
                pltpu.VMEM((tq, C), jnp.float32),    # attn @ value accumulator
            ]),
        compiler_params=pltpu.CompilerParams(
            dimension_semantics=("parallel", "parallel", "arbitrary"),
            vmem_limit_bytes=vmem_limit_bytes),
    )(*inputs)

    out_nc = out_nc[:, :N, :]
    return jnp.transpose(out_nc, (0, 2, 1)).reshape(B, C, H, W)


def init_params(key, in_dim, ratio=8):
    """Deterministic init matching the module: xavier_normal_(gain=0.02) conv
    weights, PyTorch-default uniform conv biases, gamma = 0."""
    cr = in_dim // ratio
    ks = jax.random.split(key, 6)

    def xavier_normal(k, fan_out, fan_in, gain=0.02):
        std = gain * math.sqrt(2.0 / (fan_in + fan_out))
        return std * jax.random.normal(k, (fan_out, fan_in), jnp.float32)

    def conv_bias(k, fan_out, fan_in):
        bound = 1.0 / math.sqrt(fan_in)
        return jax.random.uniform(k, (fan_out,), jnp.float32, -bound, bound)

    wq = xavier_normal(ks[0], cr, in_dim)
    bq = conv_bias(ks[1], cr, in_dim)
    wk = xavier_normal(ks[2], cr, in_dim)
    bk = conv_bias(ks[3], cr, in_dim)
    wv = xavier_normal(ks[4], in_dim, in_dim)
    bv = conv_bias(ks[5], in_dim, in_dim)
    gamma = jnp.zeros((1,), jnp.float32)
    return (wq, bq, wk, bk, wv, bv, gamma)


def reference_forward(x, y, params, cross_value=True):
    """Plain-JAX f32 reference mirroring the PyTorch forward exactly."""
    wq, bq, wk, bk, wv, bv, gamma = params
    B, C, H, W = x.shape
    N = H * W

    def conv1x1(inp, w, b):
        return jnp.einsum('oc,bchw->bohw', w, inp).reshape(B, -1, N) + b[None, :, None]

    q = jnp.transpose(conv1x1(x, wq, bq), (0, 2, 1))        # (B, N, Cr)
    k = conv1x1(y, wk, bk)                                   # (B, Cr, N)
    energy = jnp.einsum('bnc,bcm->bnm', q, k)                # (B, N, N)
    attn = jax.nn.softmax(energy, axis=-1)
    vsrc = y if cross_value else x
    v = conv1x1(vsrc, wv, bv)                                # (B, C, N)
    out = jnp.einsum('bcj,bij->bci', v, attn).reshape(B, C, H, W)
    return gamma.reshape(()) * out + x


if __name__ == "__main__":
    key = jax.random.PRNGKey(0)

    def run_case(B, C, H, W, cross_value, blk_q=None, blk_k=None):
        kx, ky, kp = jax.random.split(jax.random.fold_in(key, H * W + B), 3)
        x = jax.random.normal(kx, (B, C, H, W), jnp.float32)
        y = jax.random.normal(ky, (B, C, H, W), jnp.float32)
        wq, bq, wk, bk, wv, bv, gamma = init_params(kp, C, ratio=8)
        # Scale weights / gamma (test-only values) so the attention path is
        # numerically non-trivial; the module init gives gamma=0.
        params = (wq * 10.0, bq, wk * 10.0, bk, wv * 4.0, bv,
                  jnp.full((1,), 0.5, jnp.float32))
        out = cross_modal_attention(x, y, params, cross_value=cross_value,
                                    block_q=blk_q, block_k=blk_k)
        out = jax.block_until_ready(out)
        ref = reference_forward(x, y, params, cross_value=cross_value)
        assert out.shape == x.shape
        err = float(jnp.max(jnp.abs(out - ref)))
        assert jnp.allclose(out, ref, atol=2e-2, rtol=2e-2), (
            f"mismatch (max abs err {err}) for case {(B, C, H, W, cross_value)}")

    # Multi-tile online-softmax path (N=256 -> 2x2 q/k tiles), cross-modal values.
    run_case(B=2, C=32, H=16, W=16, cross_value=True, blk_q=128, blk_k=128)
    # Same shape, value source = x (cross_value=False branch).
    run_case(B=2, C=32, H=16, W=16, cross_value=False, blk_q=128, blk_k=128)
    # Ragged spatial size: N=120 padded to 128 with additive key-bias mask.
    run_case(B=1, C=32, H=12, W=10, cross_value=True, blk_q=128, blk_k=128)
    # Default (decoupled) tile sizes + B==1 q-tile cap: tq=128, tk=256 here.
    run_case(B=1, C=32, H=16, W=16, cross_value=True)

    print("KERNEL_OK")
</pallas_src>

<mosaic_0001>
module attributes {stable_mosaic.version = 11 : i64} {
  func.func @_cma_flash_kernel(%arg0: i32, %arg1: i32, %arg2: i32, %arg3: memref<1x1xf32, #tpu.memory_space<smem>>, %arg4: memref<1x128x32xf32, #tpu.memory_space<vmem>>, %arg5: memref<1x128x32xbf16, #tpu.memory_space<vmem>>, %arg6: memref<32x32xbf16, #tpu.memory_space<vmem>>, %arg7: memref<1x32xf32, #tpu.memory_space<vmem>>, %arg8: memref<32x32xbf16, #tpu.memory_space<vmem>>, %arg9: memref<1x32xf32, #tpu.memory_space<vmem>>, %arg10: memref<1x128x32xf32, #tpu.memory_space<vmem>>, %arg11: memref<128x32xbf16, #tpu.memory_space<vmem>>, %arg12: memref<128x1xf32, #tpu.memory_space<vmem>>, %arg13: memref<128x1xf32, #tpu.memory_space<vmem>>, %arg14: memref<128x32xf32, #tpu.memory_space<vmem>>) attributes {dimension_semantics = [#tpu.dimension_semantics<parallel>, #tpu.dimension_semantics<parallel>, #tpu.dimension_semantics<arbitrary>], iteration_bounds = array<i64: 2, 2, 2>, scalar_prefetch = 0 : i64, scratch_operands = 4 : i64, tpu.core_type = #tpu.core_type<tc>, window_params = [{transform_indices = @transform_0, window_bounds = array<i64: 1, 1>}, {transform_indices = @transform_1, window_bounds = array<i64: 1, 128, 32>}, {transform_indices = @transform_2, window_bounds = array<i64: 1, 128, 32>}, {pipeline_mode = #tpu.pipeline_mode<synchronous>, transform_indices = @transform_3, window_bounds = array<i64: 32, 32>}, {pipeline_mode = #tpu.pipeline_mode<synchronous>, transform_indices = @transform_4, window_bounds = array<i64: 1, 32>}, {pipeline_mode = #tpu.pipeline_mode<synchronous>, transform_indices = @transform_5, window_bounds = array<i64: 32, 32>}, {pipeline_mode = #tpu.pipeline_mode<synchronous>, transform_indices = @transform_6, window_bounds = array<i64: 1, 32>}, {transform_indices = @transform_7, window_bounds = array<i64: 1, 128, 32>}]} {
    %c0_i32 = arith.constant 0 : i32
    %0 = arith.cmpi eq, %arg2, %c0_i32 : i32
    %1 = arith.extui %0 : i1 to i32
    %c0_i32_0 = arith.constant 0 : i32
    %2 = arith.cmpi ne, %1, %c0_i32_0 : i32
    scf.if %2 {
      %c0_24 = arith.constant 0 : index
      %c0_25 = arith.constant 0 : index
      %c0_26 = arith.constant 0 : index
      %35 = vector.load %arg4[%c0_24, %c0_25, %c0_26] : memref<1x128x32xf32, #tpu.memory_space<vmem>>, vector<1x128x32xf32>
      %36 = vector.shape_cast %35 : vector<1x128x32xf32> to vector<128x32xf32>
      %37 = arith.truncf %36 : vector<128x32xf32> to vector<128x32xbf16>
      %c0_27 = arith.constant 0 : index
      %c0_28 = arith.constant 0 : index
      %38 = vector.load %arg6[%c0_27, %c0_28] : memref<32x32xbf16, #tpu.memory_space<vmem>>, vector<32x32xbf16>
      %cst_29 = arith.constant dense<0.000000e+00> : vector<128x32xf32>
      %39 = tpu.matmul %37, %38, %cst_29 {dimension_numbers = #tpu.dot_dimension_numbers<[1], [0], [0], [1], [0, 0, 1, 1], [], []>} : vector<128x32xbf16>, vector<32x32xbf16>, vector<128x32xf32> -> vector<128x32xf32>
      %c0_30 = arith.constant 0 : index
      %c0_31 = arith.constant 0 : index
      %40 = vector.load %arg7[%c0_30, %c0_31] : memref<1x32xf32, #tpu.memory_space<vmem>>, vector<1x32xf32>
      %41 = vector.broadcast %40 : vector<1x32xf32> to vector<128x32xf32>
      %42 = arith.addf %39, %41 : vector<128x32xf32>
      %43 = arith.truncf %42 : vector<128x32xf32> to vector<128x32xbf16>
      %c0_32 = arith.constant 0 : index
      %c0_33 = arith.constant 0 : index
      %44 = vector.load %arg11[%c0_32, %c0_33] : memref<128x32xbf16, #tpu.memory_space<vmem>>, vector<128x32xbf16>
      tpu.vector_store %arg11[%c0_32, %c0_33], %43 {strides = array<i32>} : memref<128x32xbf16, #tpu.memory_space<vmem>>, vector<128x32xbf16>,
      %cst_34 = arith.constant 0xFF800000 : f32
      %45 = vector.broadcast %cst_34 : f32 to vector<128x1xf32>
      %c0_35 = arith.constant 0 : index
      %c0_36 = arith.constant 0 : index
      %46 = vector.load %arg12[%c0_35, %c0_36] : memref<128x1xf32, #tpu.memory_space<vmem>>, vector<128x1xf32>
      tpu.vector_store %arg12[%c0_35, %c0_36], %45 {strides = array<i32>} : memref<128x1xf32, #tpu.memory_space<vmem>>, vector<128x1xf32>,
      %cst_37 = arith.constant 0.000000e+00 : f32
      %47 = vector.broadcast %cst_37 : f32 to vector<128x1xf32>
      %c0_38 = arith.constant 0 : index
      %c0_39 = arith.constant 0 : index
      %48 = vector.load %arg13[%c0_38, %c0_39] : memref<128x1xf32, #tpu.memory_space<vmem>>, vector<128x1xf32>
      tpu.vector_store %arg13[%c0_38, %c0_39], %47 {strides = array<i32>} : memref<128x1xf32, #tpu.memory_space<vmem>>, vector<128x1xf32>,
      %cst_40 = arith.constant 0.000000e+00 : f32
      %49 = vector.broadcast %cst_40 : f32 to vector<128x32xf32>
      %c0_41 = arith.constant 0 : index
      %c0_42 = arith.constant 0 : index
      %50 = vector.load %arg14[%c0_41, %c0_42] : memref<128x32xf32, #tpu.memory_space<vmem>>, vector<128x32xf32>
      tpu.vector_store %arg14[%c0_41, %c0_42], %49 {strides = array<i32>} : memref<128x32xf32, #tpu.memory_space<vmem>>, vector<128x32xf32>,
    } else {
    }
    %c0 = arith.constant 0 : index
    %c0_1 = arith.constant 0 : index
    %c0_2 = arith.constant 0 : index
    %3 = vector.load %arg5[%c0, %c0_1, %c0_2] : memref<1x128x32xbf16, #tpu.memory_space<vmem>>, vector<1x128x32xbf16>
    %4 = vector.shape_cast %3 : vector<1x128x32xbf16> to vector<128x32xbf16>
    %c0_3 = arith.constant 0 : index
    %c0_4 = arith.constant 0 : index
    %5 = vector.load %arg11[%c0_3, %c0_4] : memref<128x32xbf16, #tpu.memory_space<vmem>>, vector<128x32xbf16>
    %cst = arith.constant dense<0.000000e+00> : vector<128x128xf32>
    %6 = tpu.matmul %5, %4, %cst {dimension_numbers = #tpu.dot_dimension_numbers<[1], [1], [0], [0], [0, 0, 1, 0], [], []>} : vector<128x32xbf16>, vector<128x32xbf16>, vector<128x128xf32> -> vector<128x128xf32>
    %c0_5 = arith.constant 0 : index
    %c0_6 = arith.constant 0 : index
    %7 = vector.load %arg12[%c0_5, %c0_6] : memref<128x1xf32, #tpu.memory_space<vmem>>, vector<128x1xf32>
    %cst_7 = arith.constant dense<0xFF800000> : vector<128xf32>
    %8 = vector.multi_reduction <maximumf>, %6, %cst_7 [1] : vector<128x128xf32> to vector<128xf32>
    %9 = vector.shape_cast %8 : vector<128xf32> to vector<128x1xf32>
    %10 = arith.maximumf %7, %9 : vector<128x1xf32>
    %11 = arith.subf %7, %10 : vector<128x1xf32>
    %12 = math.exp %11 : vector<128x1xf32>
    %13 = vector.broadcast %10 : vector<128x1xf32> to vector<128x128xf32>
    %14 = arith.subf %6, %13 : vector<128x128xf32>
    %15 = math.exp %14 : vector<128x128xf32>
    %c0_8 = arith.constant 0 : index
    %c0_9 = arith.constant 0 : index
    %16 = vector.load %arg13[%c0_8, %c0_9] : memref<128x1xf32, #tpu.memory_space<vmem>>, vector<128x1xf32>
    %17 = arith.mulf %12, %16 : vector<128x1xf32>
    %cst_10 = arith.constant dense<0.000000e+00> : vector<128xf32>
    %18 = vector.multi_reduction <add>, %15, %cst_10 [1] : vector<128x128xf32> to vector<128xf32>
    %19 = vector.shape_cast %18 : vector<128xf32> to vector<128x1xf32>
    %20 = arith.addf %17, %19 : vector<128x1xf32>
    %c0_11 = arith.constant 0 : index
    %c0_12 = arith.constant 0 : index
    %21 = vector.load %arg13[%c0_11, %c0_12] : memref<128x1xf32, #tpu.memory_space<vmem>>, vector<128x1xf32>
    tpu.vector_store %arg13[%c0_11, %c0_12], %20 {strides = array<i32>} : memref<128x1xf32, #tpu.memory_space<vmem>>, vector<128x1xf32>,
    %c0_13 = arith.constant 0 : index
    %c0_14 = arith.constant 0 : index
    %22 = vector.load %arg14[%c0_13, %c0_14] : memref<128x32xf32, #tpu.memory_space<vmem>>, vector<128x32xf32>
    %23 = vector.broadcast %12 : vector<128x1xf32> to vector<128x32xf32>
    %24 = arith.mulf %23, %22 : vector<128x32xf32>
    %25 = arith.truncf %15 : vector<128x128xf32> to vector<128x128xbf16>
    %c0_15 = arith.constant 0 : index
    %c0_16 = arith.constant 0 : index
    %c0_17 = arith.constant 0 : index
    %26 = vector.load %arg5[%c0_15, %c0_16, %c0_17] : memref<1x128x32xbf16, #tpu.memory_space<vmem>>, vector<1x128x32xbf16>
    %27 = vector.shape_cast %26 : vector<1x128x32xbf16> to vector<128x32xbf16>
    %cst_18 = arith.constant dense<0.000000e+00> : vector<128x32xf32>
    %28 = tpu.matmul %25, %27, %cst_18 {dimension_numbers = #tpu.dot_dimension_numbers<[1], [0], [0], [1], [0, 0, 1, 1], [], []>} : vector<128x128xbf16>, vector<128x32xbf16>, vector<128x32xf32> -> vector<128x32xf32>
    %29 = arith.addf %24, %28 : vector<128x32xf32>
    %c0_19 = arith.constant 0 : index
    %c0_20 = arith.constant 0 : index
    %30 = vector.load %arg14[%c0_19, %c0_20] : memref<128x32xf32, #tpu.memory_space<vmem>>, vector<128x32xf32>
    tpu.vector_store %arg14[%c0_19, %c0_20], %29 {strides = array<i32>} : memref<128x32xf32, #tpu.memory_space<vmem>>, vector<128x32xf32>,
    %c0_21 = arith.constant 0 : index
    %c0_22 = arith.constant 0 : index
    %31 = vector.load %arg12[%c0_21, %c0_22] : memref<128x1xf32, #tpu.memory_space<vmem>>, vector<128x1xf32>
    tpu.vector_store %arg12[%c0_21, %c0_22], %10 {strides = array<i32>} : memref<128x1xf32, #tpu.memory_space<vmem>>, vector<128x1xf32>,
    %c1_i32 = arith.constant 1 : i32
    %32 = arith.cmpi eq, %arg2, %c1_i32 : i32
    %33 = arith.extui %32 : i1 to i32
    %c0_i32_23 = arith.constant 0 : i32
    %34 = arith.cmpi ne, %33, %c0_i32_23 : i32
    scf.if %34 {
      %c0_24 = arith.constant 0 : index
      %c0_25 = arith.constant 0 : index
      %35 = vector.load %arg14[%c0_24, %c0_25] : memref<128x32xf32, #tpu.memory_space<vmem>>, vector<128x32xf32>
      %c0_26 = arith.constant 0 : index
      %c0_27 = arith.constant 0 : index
      %36 = vector.load %arg13[%c0_26, %c0_27] : memref<128x1xf32, #tpu.memory_space<vmem>>, vector<128x1xf32>
      %37 = tpu.reciprocal %36 {approx = true} : vector<128x1xf32> -> vector<128x1xf32>
      %38 = vector.broadcast %37 : vector<128x1xf32> to vector<128x32xf32>
      %39 = arith.mulf %35, %38 : vector<128x32xf32>
      %40 = arith.truncf %39 : vector<128x32xf32> to vector<128x32xbf16>
      %c0_28 = arith.constant 0 : index
      %c0_29 = arith.constant 0 : index
      %41 = vector.load %arg8[%c0_28, %c0_29] : memref<32x32xbf16, #tpu.memory_space<vmem>>, vector<32x32xbf16>
      %cst_30 = arith.constant dense<0.000000e+00> : vector<128x32xf32>
      %42 = tpu.matmul %40, %41, %cst_30 {dimension_numbers = #tpu.dot_dimension_numbers<[1], [0], [0], [1], [0, 0, 1, 1], [], []>} : vector<128x32xbf16>, vector<32x32xbf16>, vector<128x32xf32> -> vector<128x32xf32>
      %c0_31 = arith.constant 0 : index
      %c0_32 = arith.constant 0 : index
      %43 = vector.load %arg9[%c0_31, %c0_32] : memref<1x32xf32, #tpu.memory_space<vmem>>, vector<1x32xf32>
      %44 = vector.broadcast %43 : vector<1x32xf32> to vector<128x32xf32>
      %45 = arith.addf %42, %44 : vector<128x32xf32>
      %c0_33 = arith.constant 0 : index
      %c0_34 = arith.constant 0 : index
      %46 = memref.load %arg3[%c0_33, %c0_34] : memref<1x1xf32, #tpu.memory_space<smem>>
      %47 = vector.broadcast %46 : f32 to vector<128x32xf32>
      %48 = arith.mulf %47, %45 : vector<128x32xf32>
      %c0_35 = arith.constant 0 : index
      %c0_36 = arith.constant 0 : index
      %c0_37 = arith.constant 0 : index
      %49 = vector.load %arg4[%c0_35, %c0_36, %c0_37] : memref<1x128x32xf32, #tpu.memory_space<vmem>>, vector<1x128x32xf32>
      %50 = vector.shape_cast %49 : vector<1x128x32xf32> to vector<128x32xf32>
      %51 = arith.addf %48, %50 : vector<128x32xf32>
      %c0_38 = arith.constant 0 : index
      %c0_39 = arith.constant 0 : index
      %c0_40 = arith.constant 0 : index
      %52 = vector.load %arg10[%c0_38, %c0_39, %c0_40] : memref<1x128x32xf32, #tpu.memory_space<vmem>>, vector<1x128x32xf32>
      %53 = vector.shape_cast %52 : vector<1x128x32xf32> to vector<128x32xf32>
      %54 = vector.shape_cast %51 : vector<128x32xf32> to vector<1x128x32xf32>
      tpu.vector_store %arg10[%c0_38, %c0_39, %c0_40], %54 {strides = array<i32>} : memref<1x128x32xf32, #tpu.memory_space<vmem>>, vector<1x128x32xf32>,
    } else {
    }
    return
  }
  func.func @transform_0(%arg0: i32, %arg1: i32, %arg2: i32) -> (i32, i32) {
    %c0_i32 = arith.constant 0 : i32
    %c0_i32_0 = arith.constant 0 : i32
    %c0_i32_1 = arith.constant 0 : i32
    return %c0_i32, %c0_i32_0 : i32, i32
  }
  func.func @transform_1(%arg0: i32, %arg1: i32, %arg2: i32) -> (i32, i32, i32) {
    %c0_i32 = arith.constant 0 : i32
    %c0_i32_0 = arith.constant 0 : i32
    return %arg0, %arg1, %c0_i32 : i32, i32, i32
  }
  func.func @transform_2(%arg0: i32, %arg1: i32, %arg2: i32) -> (i32, i32, i32) {
    %c0_i32 = arith.constant 0 : i32
    %c0_i32_0 = arith.constant 0 : i32
    return %arg0, %arg2, %c0_i32 : i32, i32, i32
  }
  func.func @transform_3(%arg0: i32, %arg1: i32, %arg2: i32) -> (i32, i32) {
    %c0_i32 = arith.constant 0 : i32
    %c0_i32_0 = arith.constant 0 : i32
    %c0_i32_1 = arith.constant 0 : i32
    return %c0_i32, %c0_i32_0 : i32, i32
  }
  func.func @transform_4(%arg0: i32, %arg1: i32, %arg2: i32) -> (i32, i32) {
    %c0_i32 = arith.constant 0 : i32
    %c0_i32_0 = arith.constant 0 : i32
    %c0_i32_1 = arith.constant 0 : i32
    return %c0_i32, %c0_i32_0 : i32, i32
  }
  func.func @transform_5(%arg0: i32, %arg1: i32, %arg2: i32) -> (i32, i32) {
    %c0_i32 = arith.constant 0 : i32
    %c0_i32_0 = arith.constant 0 : i32
    %c0_i32_1 = arith.constant 0 : i32
    return %c0_i32, %c0_i32_0 : i32, i32
  }
  func.func @transform_6(%arg0: i32, %arg1: i32, %arg2: i32) -> (i32, i32) {
    %c0_i32 = arith.constant 0 : i32
    %c0_i32_0 = arith.constant 0 : i32
    %c0_i32_1 = arith.constant 0 : i32
    return %c0_i32, %c0_i32_0 : i32, i32
  }
  func.func @transform_7(%arg0: i32, %arg1: i32, %arg2: i32) -> (i32, i32, i32) {
    %c0_i32 = arith.constant 0 : i32
    %c0_i32_0 = arith.constant 0 : i32
    return %arg0, %arg1, %c0_i32 : i32, i32, i32
  }
}

</mosaic_0001>

<bundles_post_ra>
// kernel: tpu_custom_call.1
= control target key start
LH: loop header
LB: loop body
LE: loop exit
PB: predicated region body
PF: predicated region fallthrough
CT: control target
= control target key end

     0   :  { %s4066_s0 = inlined_call_operand.<no memory space> [shape: f32[1,1], index: 0, kind: input, shape index: {}]   ;;  %s4067_s1 = inlined_call_operand.hbm [shape: f32[2,256,32], index: 1, kind: input, shape index: {}]   ;;  %s4068_s2 = inlined_call_operand.hbm [shape: bf16[2,256,32], index: 2, kind: input, shape index: {}]   ;;  %s4069_s3 = inlined_call_operand.hbm [shape: bf16[32,32], index: 3, kind: input, shape index: {}]   ;;  %s4070_s4 = inlined_call_operand.hbm [shape: f32[1,32], index: 4, kind: input, shape index: {}]   ;;  %s4071_s5 = inlined_call_operand.hbm [shape: bf16[32,32], index: 5, kind: input, shape index: {}]   ;;  %s4072_s6 = inlined_call_operand.hbm [shape: f32[1,32], index: 6, kind: input, shape index: {}]   ;;  %s4073_s7 = inlined_call_operand.hbm [shape: f32[2,256,32], index: 7, kind: output, shape index: {}]  }
   0x1   :  { %4096 = sst [smem:[#allocation36_spill]] %s4067_s1 }
   0x2   :  { %4097 = sst [smem:[#allocation37_spill]] %s4069_s3 }
   0x3   :  { %4098 = sst [smem:[#allocation38_spill]] %s4070_s4 }
   0x4   :  { %4099 = sst [smem:[#allocation39_spill]] %s4071_s5 }
   0x5   :  { %4100 = sst [smem:[#allocation40_spill]] %s4072_s6 }
   0x6   :  { %4101 = sst [smem:[#allocation41_spill]] %s4073_s7 }
   0x7   :  { %12 = sst [smem:[#allocation6]] %s4066_s0 }
   0x8   :  { %13 = vsyncpa [#allocation8], 0 }
   0x9   :  { %15 = vsyncpa [#allocation8 + $0x1], 0 }
   0xa   :  { %16 = vsyncpa [#allocation11], 0 }
   0xb   :  { %18 = vsyncpa [#allocation11 + $0x1], 0 }
   0xc   :  { %19 = vsyncpa [#allocation14], 0 }
   0xd   :  { %20 = vsyncpa [#allocation17], 0 }
   0xe   :  { %21 = vsyncpa [#allocation9], 0 }
   0xf   :  { %23 = vsyncpa [#allocation9 + $0x1], 0  ;;  %s3013_s26 = smov 0   ;;  %s3015_s27 = smov 0  }
  0x10   :  { %s3017_s28 = smov 0   ;;  %s3019_s29 = smov 0  }
  0x11   :  { %s3021_s30 = smov 0   ;;  %s3023_s8 = smov 0  }
  0x12   :  { %s3025_s0 = smov 0   ;;  %s3027_s9 = smov 0  }
  0x13   :  { %s3029_s10 = smov 0   ;;  %s3031_s11 = smov 0  }
  0x14   :  { %s3033_s12 = smov 0   ;;  %s3035_s13 = smov 0  }
  0x15   :  { %s3037_s14 = smov 0  }
  0x16 LB: > { %4102 = sst [smem:[#allocation25_spill]] %s2915_s29  ;;  %s3077_s15 = sadd.s32 4294967295, %s2951_s14   ;;  %s2951_s14 = sphi %s3037_s14, %s29_s14   ;;  %s2947_s13 = sphi %s3035_s13, %s4172_s13   ;;  %s2943_s12 = sphi %s3033_s12, %s4171_s12   ;;  %s2939_s11 = sphi %s3031_s11, %s4170_s11   ;;  %s2935_s10 = sphi %s3029_s10, %s4169_s10   ;;  %s2931_s9 = sphi %s3027_s9, %s4168_s9   ;;  %s2927_s0 = sphi %s3025_s0, %s4167_s0   ;;  %s2923_s8 = sphi %s3023_s8, %s4166_s8   ;;  %s2919_s30 = sphi %s3021_s30, %s4165_s30   ;;  %s2915_s29 = sphi %s3019_s29, %s4164_s29   ;;  %s2911_s28 = sphi %s3017_s28, %s4163_s28   ;;  %s2907_s27 = sphi %s3015_s27, %s4162_s27   ;;  %s2903_s26 = sphi %s3013_s26, %s4161_s26  }
  0x17   : > { %4103 = sst [smem:[#allocation26_spill]] %s2927_s0  ;;  %p119_p0 = scmp.ne.s32.totalorder %s2907_s27, %s2903_s26 }
  0x18   : > { %4104 = sst [smem:[#allocation27_spill]] %s2931_s9  ;;  %p4075_p1 = scmp.eq.s32.totalorder %s3077_s15, 0 }
  0x19   : > { %4105 = sst [smem:[#allocation28_spill]] %s2935_s10  ;;  %p2083_p3 = scmp.ge.s32.totalorder %s2951_s14, 1 }
  0x1a   : > { %4106 = sst [smem:[#allocation29_spill]] %s3077_s15  ;;  %p242_p4 = scmp.lt.s32.totalorder %s2951_s14, 9 }
  0x1b   : > { %p3086_p5 = por %p119_p0, %p4075_p1  ;;  %s2953_s18 = smov [#allocation12]  }
  0x1c   : > { %p3090_p6 = pnand %p2083_p3, %p242_p4  ;;  %s257_s19 = sshll.u32 %s2953_s18, 4  ;;  %s258_s19 = int_to_ptr.vmem [resolvable:$true] %s257_s19 }
  0x1d   : > { %s4107_s16 = scalar_select %p3086_p5, 1, 0 }
  0x1e   : > { %s4109_s17 = scalar_select %p3090_p6, 1, 0 }
  0x1f   : > { %4108 = sst [smem:[#allocation30_spill]] %s4107_s16  ;;  %p2353_p7 = pneg %p3090_p6 }
  0x20   : > { %4110 = sst [smem:[#allocation31_spill]] %s4109_s17  ;;  %s2954_s21 = smov [#allocation13]  }
  0x21   : > { %p3098_p8 = pnand %p2353_p7, %p4075_p1  ;;  %s271_s22 = sshll.u32 %s2954_s21, 4  ;;  %s3102_s22 = int_to_ptr.vmem [resolvable:$true] %s271_s22 }
  0x22   : > { %s4112_s3 = sld [smem:[#allocation37_spill]] }
  0x23   : > { %p3112_p10 = pneg %p3098_p8 }
  0x28   : > { %s2625_s25 = scalar_lea.hbm %s4112_s3, 256 }
  0x29   : > { %p2626_p9 = scmp.ne.s32.totalorder %s4112_s3, %s2625_s25  ;;  %p2632_p13 = scmp.lt.u32.totalorder %s2625_s25, %s4112_s3 }
  0x2b   : > { %p2628_p11 = pnand %p3112_p10, %p2626_p9 }
  0x2d   : > { %p2629_p12 = pneg %p2628_p11 }
  0x2f   : > { %p2634_p0 = pnand %p2632_p13, %p2629_p12 }
  0x31   : > { %2637 = shalt.err (!%p2634_p0)
}
  0x32   : > { %s2638_s23 = scalar_lea.vmem %s258_s19, 256  ;;  %p2646_p2 = scmp.lt.s32.totalorder %s258_s19, %s258_s19 }
  0x33   : > { %p2639_p3 = scmp.ne.s32.totalorder %s258_s19, %s2638_s23  ;;  %p2647_p1 = scmp.lt.s32.totalorder %s2638_s23, %s2638_s23 }
  0x35   : > { %p2641_p4 = pnand %p2639_p3, %p3112_p10  ;;  %p2648_p5 = por %p2647_p1, %p2646_p2 }
  0x37   : > { %p2642_p7 = pneg %p2641_p4 }
  0x39   : > { %p2649_p6 = pnand %p2648_p5, %p2642_p7 }
  0x3b   : > { %2652 = shalt.err (!%p2649_p6)
}
  0x3c   : > { %s4081_s7 = smov 64   ;;  %s4083_s24 = smov 4  }
  0x3d   : > { %2356 = dma.hbm_to_vmem [thread:$0]  (!%p3098_p8), %s4112_s3, 256, %s258_s19, [#allocation11], %s4081_s7, %s4081_s7, %s4083_s24  }
  0x3e   : > { %s4114_s4 = sld [smem:[#allocation38_spill]] }
  0x44   : > { %s2653_s9 = scalar_lea.hbm %s4114_s4, 16 }
  0x45   : > { %p2654_p1 = scmp.ne.s32.totalorder %s4114_s4, %s2653_s9  ;;  %p2660_p6 = scmp.lt.u32.totalorder %s2653_s9, %s4114_s4 }
  0x47   : > { %p2656_p2 = pnand %p2654_p1, %p3112_p10 }
  0x49   : > { %p2657_p5 = pneg %p2656_p2 }
  0x4b   : > { %p2662_p9 = pnand %p2660_p6, %p2657_p5 }
  0x4d   : > { %2665 = shalt.err (!%p2662_p9)
}
  0x4e   : > { %s2666_s19 = scalar_lea.vmem %s3102_s22, 16  ;;  %s2673_s0 = scalar_lea.vmem %s3102_s22, 32 }
  0x4f   : > { %p2667_p11 = scmp.ne.s32.totalorder %s3102_s22, %s2666_s19  ;;  %p2674_p0 = scmp.lt.s32.totalorder %s3102_s22, %s3102_s22 }
  0x50   : > { %p2675_p3 = scmp.lt.s32.totalorder %s2673_s0, %s2666_s19 }
  0x51   : > { %p2669_p12 = pnand %p2667_p11, %p3112_p10 }
  0x52   : > { %p2676_p4 = por %p2675_p3, %p2674_p0 }
  0x53   : > { %p2670_p13 = pneg %p2669_p12 }
  0x55   : > { %p2677_p7 = pnand %p2676_p4, %p2670_p13 }
  0x57   : > { %2680 = shalt.err (!%p2677_p7)
}
  0x58   : > { %2359 = dma.hbm_to_vmem [thread:$0]  (!%p3098_p8), %s4114_s4, 16, %s3102_s22, [#allocation14]  }
  0x59   : > { %s2957_s17 = smov [#allocation15]   ;;  %s2958_s25 = smov [#allocation16]  }
  0x5a   : > { %s281_s10 = sshll.u32 %s2957_s17, 4  ;;  %s295_s26 = sshll.u32 %s2958_s25, 4  ;;  %s282_s10 = int_to_ptr.vmem [resolvable:$true] %s281_s10  ;;  %s296_s26 = int_to_ptr.vmem [resolvable:$true] %s295_s26 }
  0x5b   : > { %s4115_s5 = sld [smem:[#allocation39_spill]] }
  0x61   : > { %s2681_s19 = scalar_lea.hbm %s4115_s5, 256 }
  0x62   : > { %p2682_p1 = scmp.ne.s32.totalorder %s4115_s5, %s2681_s19  ;;  %p2688_p6 = scmp.lt.u32.totalorder %s2681_s19, %s4115_s5 }
  0x64   : > { %p2684_p2 = pnand %p2682_p1, %p3112_p10 }
  0x66   : > { %p2685_p5 = pneg %p2684_p2 }
  0x68   : > { %p2690_p9 = pnand %p2688_p6, %p2685_p5 }
  0x6a   : > { %2693 = shalt.err (!%p2690_p9)
}
  0x6b   : > { %s2694_s22 = scalar_lea.vmem %s282_s10, 256  ;;  %p2702_p0 = scmp.lt.s32.totalorder %s282_s10, %s282_s10 }
  0x6c   : > { %p2695_p11 = scmp.ne.s32.totalorder %s282_s10, %s2694_s22  ;;  %p2703_p3 = scmp.lt.s32.totalorder %s2694_s22, %s2694_s22 }
  0x6e   : > { %p2697_p12 = pnand %p2695_p11, %p3112_p10  ;;  %p2704_p4 = por %p2703_p3, %p2702_p0 }
  0x70   : > { %p2698_p13 = pneg %p2697_p12 }
  0x72   : > { %p2705_p7 = pnand %p2704_p4, %p2698_p13 }
  0x74   : > { %2708 = shalt.err (!%p2705_p7)
}
  0x75   : > { %s4116_s7 = smov 4   ;;  %s4117_s16 = smov 64  }
  0x76   : > { %2362 = dma.hbm_to_vmem [thread:$0]  (!%p3098_p8), %s4115_s5, 256, %s282_s10, [#allocation14], %s4117_s16, %s4117_s16, %s4116_s7  }
  0x77   : > { %s4118_s6 = sld [smem:[#allocation40_spill]] }
  0x7d   : > { %s2709_s23 = scalar_lea.hbm %s4118_s6, 16 }
  0x7e   : > { %p2710_p1 = scmp.ne.s32.totalorder %s4118_s6, %s2709_s23  ;;  %p2716_p6 = scmp.lt.u32.totalorder %s2709_s23, %s4118_s6 }
  0x80   : > { %p2712_p2 = pnand %p2710_p1, %p3112_p10 }
  0x82   : > { %p2713_p5 = pneg %p2712_p2 }
  0x84   : > { %p2718_p9 = pnand %p2716_p6, %p2713_p5 }
  0x86   : > { %2721 = shalt.err (!%p2718_p9)
}
  0x87   : > { %s2722_s24 = scalar_lea.vmem %s296_s26, 16  ;;  %s2729_s10 = scalar_lea.vmem %s296_s26, 32 }
  0x88   : > { %p2723_p11 = scmp.ne.s32.totalorder %s296_s26, %s2722_s24  ;;  %p2730_p0 = scmp.lt.s32.totalorder %s296_s26, %s296_s26 }
  0x89   : > { %p2731_p3 = scmp.lt.s32.totalorder %s2729_s10, %s2722_s24 }
  0x8a   : > { %p2725_p12 = pnand %p2723_p11, %p3112_p10 }
  0x8b   : > { %p2732_p4 = por %p2731_p3, %p2730_p0 }
  0x8c   : > { %p2726_p13 = pneg %p2725_p12 }
  0x8e   : > { %p2733_p7 = pnand %p2732_p4, %p2726_p13 }
  0x90   : > { %2736 = shalt.err (!%p2733_p7)
}
  0x91   : > { %2365 = dma.hbm_to_vmem [thread:$0]  (!%p3098_p8), %s4118_s6, 16, %s296_s26, [#allocation17]  }
  0x92   : > { %s2082_s20 = sadd.s32 4294967294, %s2951_s14   ;;  %s41_s18 = sadd.s32 1, %s2939_s11 }
  0x93   : > { %s44_s21 = sadd.s32 1, %s2943_s12  ;;  %p42_p10 = scmp.ge.s32.totalorder %s41_s18, 2 }
  0x94   : > { %s48_s23 = sadd.s32 1, %s2947_s13  ;;  %s78_s19 = sadd.s32 1, %s2923_s8 }
  0x95   : > { %p85_p1 = scmp.ne.s32.totalorder %s2923_s8, %s2919_s30  ;;  %s4174_s18 = smov (%p42_p10, %s41_s18), 0 }
  0x96   : > { %4119 = sst [smem:[#allocation32_spill]] %s4174_s18  ;;  %s4176_s21 = smov (!%p42_p10, %s44_s21), %s2943_s12 }
  0x97   : > { %p4093_p2 = scmp.eq.s32.totalorder %s2951_s14, 0  ;;  %p91_p8 = scmp.ne.s32.totalorder %s2919_s30, %s2915_s29 }
  0x98   : > { %p46_p5 = scmp.ge.s32.totalorder %s4176_s21, 2  ;;  %s102_s26 = ssub.s32 %s2939_s11, %s4174_s18 }
  0x99   : > { %p3211_p6 = por %p4093_p2, %p85_p1  ;;  %p4121_p9 = scmp.eq.s32.totalorder %s3077_s15, 0 }
  0x9a   : > { %s4178_s21 = smov (%p46_p5, %s4176_s21), 0  ;;  %s4180_s23 = smov (!%p46_p5, %s48_s23), %s2947_s13 }
  0x9b   : > { %p3220_p11 = por %p4121_p9, %p91_p8  ;;  %4123 = sst [smem:[#allocation33_spill]] %s4178_s21 }
  0x9c   : > { %s74_s22 = ssub.s32 %s2943_s12, %s4178_s21  ;;  %p4124_p12 = scmp.eq.s32.totalorder %s3077_s15, 7 }
  0x9d   : > { %p50_p0 = scmp.ge.s32.totalorder %s4180_s23, 2  ;;  %p235_p3 = scmp.eq.s32.totalorder %s2082_s20, 7 }
  0x9e   : > { %p3231_p13 = por %p4124_p12, %p85_p1  ;;  %p4092_p4 = scmp.lt.s32.totalorder %s2951_s14, 8 }
  0x9f   : > { %s306_s10 = sand.u32 1, %s2923_s8   ;;  %s4182_s23 = smov (%p50_p0, %s4180_s23), 0 }
  0xa0   : > { %s4125_s24 = scalar_select %p3231_p13, 1, 0 }
  0xa1   : > { %4127 = sst [smem:[#allocation35_spill]] %s4182_s23  ;;  %p3242_p7 = por %p235_p3, %p91_p8 }
  0xa2   : > { %4126 = sst [smem:[#allocation34_spill]] %s4125_s24  ;;  %s73_s25 = ssub.s32 %s2947_s13, %s4182_s23 }
  0xa3   : > { %s4128_s17 = scalar_select %p3242_p7, 1, 0 }
  0xa4   : > { %s2089_s3 = sshll.u32 %s306_s10, 7  ;;  %s75_s4 = sor.u32 %s74_s22, %s73_s25 }
  0xa5   : > { %s3248_s5 = sor.u32 %s102_s26, %s73_s25  ;;  %p76_p10 = scmp.eq.s32.totalorder %s75_s4, 0 }
  0xa6   : > { %s2090_s20 = sshll.u32 %s2943_s12, 4  ;;  %s2091_s21 = sshll.u32 %s2947_s13, 5 }
  0xa7   : > { %s3253_s6 = scalar_select %p76_p10, %s2923_s8, %s78_s19  }
  0xa8   : > { %s310_s18 = scalar_lea.vmem [#allocation7], %s2089_s3  ;;  %s316_s24 = sadd.s32 %s2091_s21, %s2090_s20 }
  0xa9   : > { %s319_s29 = sshll.u32 %s310_s18, 4  ;;  %s2092_s15 = sshll.u32 %s316_s24, 7  ;;  %s3258_s29 = int_to_ptr.vmem [resolvable:$true] %s319_s29 }
  0xaa   : > { %p3264_p8 = pnand %p4092_p4, %p3211_p6  ;;  %s4130_s1 = sld [smem:[#allocation36_spill]] }
  0xab   : > { %s3273_s3 = scalar_lea.sflag [#allocation8], %s306_s10 }
  0xac   : > { %p2739_p6 = pneg %p3264_p8 }
  0xb0   : > { %s3271_s19 = scalar_lea.hbm %s4130_s1, %s2092_s15  ;;  %s2742_s25 = scalar_lea.hbm %s4130_s1, 8192 }
  0xb1   : > { %s2737_s18 = scalar_lea.hbm %s3271_s19, 2048  ;;  %p2743_p0 = scmp.lt.u32.totalorder %s3271_s19, %s4130_s1 }
  0xb2   : > { %p2738_p5 = scmp.ne.s32.totalorder %s3271_s19, %s2737_s18  ;;  %p2744_p3 = scmp.lt.u32.totalorder %s2742_s25, %s2737_s18 }
  0xb3   : > { %p2746_p4 = scmp.lt.u32.totalorder %s2737_s18, %s3271_s19 }
  0xb4   : > { %p2740_p9 = pnand %p2739_p6, %p2738_p5  ;;  %p2745_p10 = por %p2744_p3, %p2743_p0 }
  0xb6   : > { %p2741_p12 = pneg %p2740_p9  ;;  %p2747_p2 = por %p2746_p4, %p2745_p10 }
  0xb8   : > { %p2748_p1 = pnand %p2747_p2, %p2741_p12 }
  0xba   : > { %2751 = shalt.err (!%p2748_p1)
}
  0xbb   : > { %s2752_s10 = scalar_lea.vmem %s3258_s29, 2048  ;;  %s2959_s26 = smov [#allocation7]  }
  0xbc   : > { %p2753_p5 = scmp.ne.s32.totalorder %s3258_s29, %s2752_s10  ;;  %s2757_s4 = sshll.u32 %s2959_s26, 4  ;;  %s2758_s4 = int_to_ptr.vmem [resolvable:$false] %s2757_s4 }
  0xbd   : > { %s2759_s0 = scalar_lea.vmem %s2758_s4, 4096  ;;  %p2760_p13 = scmp.lt.s32.totalorder %s3258_s29, %s2758_s4 }
  0xbe   : > { %p2755_p9 = pnand %p2753_p5, %p2739_p6  ;;  %p2761_p0 = scmp.lt.s32.totalorder %s2759_s0, %s2752_s10 }
  0xc0   : > { %p2756_p7 = pneg %p2755_p9  ;;  %p2762_p3 = por %p2761_p0, %p2760_p13 }
  0xc2   : > { %p2763_p4 = pnand %p2762_p3, %p2756_p7 }
  0xc4   : > { %2766 = shalt.err (!%p2763_p4)
}
  0xc5   : > { %s2960_s18 = smov 128   ;;  %s2961_s24 = smov 8  }
  0xc6   : > { %2369 = dma.hbm_to_vmem [thread:$0]  (!%p3264_p8), %s3271_s19, 2048, %s3258_s29, %s3273_s3, %s2960_s18, %s2960_s18, %s2961_s24  }
  0xc7   : > { %s2094_s25 = sshll.u32 %s2939_s11, 4  ;;  %s106_s20 = sadd.s32 1, %s2911_s28 }
  0xc8   : > { %s339_s15 = sadd.s32 %s2094_s25, %s2091_s21  ;;  %p113_p2 = scmp.ne.s32.totalorder %s2911_s28, %s2907_s27 }
  0xc9   : > { %s2096_s10 = sshll.u32 %s339_s15, 6  ;;  %p4131_p13 = scmp.eq.s32.totalorder %s3248_s5, 0 }
  0xca   : > { %p4132_p7 = scmp.eq.s32.totalorder %s2951_s14, 0  ;;  %s329_s4 = sand.u32 1, %s2951_s14  }
  0xcb   : > { %s3310_s26 = scalar_select %p4131_p13, %s2911_s28, %s106_s20  }
  0xcc   : > { %p115_p1 = por %p113_p2, %p4132_p7  ;;  %s3318_s23 = scalar_lea.hbm %s4068_s2, %s2096_s10 }
  0xcd   : > { %s331_s29 = sand.u32 1, %s2911_s28   ;;  %p4133_p8 = scmp.lt.s32.totalorder %s2951_s14, 8 }
  0xce   : > { %s2093_s21 = sshll.u32 %s331_s29, 6  ;;  %s3329_s1 = scalar_lea.sflag [#allocation11], %s329_s4 }
  0xcf   : > { %p3323_p6 = pnand %p4133_p8, %p115_p1  ;;  %s333_s5 = scalar_lea.vmem [#allocation10], %s2093_s21 }
  0xd0   : > { %s342_s19 = sshll.u32 %s333_s5, 4  ;;  %s2767_s3 = scalar_lea.hbm %s3318_s23, 1024  ;;  %s3327_s19 = int_to_ptr.vmem [resolvable:$true] %s342_s19 }
  0xd1   : > { %p2768_p12 = scmp.ne.s32.totalorder %s3318_s23, %s2767_s3  ;;  %p2769_p10 = pneg %p3323_p6 }
  0xd2   : > { %s2772_s25 = scalar_lea.hbm %s4068_s2, 4096  ;;  %p2773_p0 = scmp.lt.u32.totalorder %s3318_s23, %s4068_s2 }
  0xd3   : > { %p2770_p5 = pnand %p2769_p10, %p2768_p12  ;;  %p2774_p3 = scmp.lt.u32.totalorder %s2772_s25, %s2767_s3 }
  0xd4   : > { %p2776_p2 = scmp.lt.u32.totalorder %s2767_s3, %s3318_s23 }
  0xd5   : > { %p2771_p9 = pneg %p2770_p5  ;;  %p2775_p4 = por %p2774_p3, %p2773_p0 }
  0xd7   : > { %p2777_p13 = por %p2776_p2, %p2775_p4 }
  0xd9   : > { %p2778_p7 = pnand %p2777_p13, %p2771_p9 }
  0xdb   : > { %2781 = shalt.err (!%p2778_p7)
}
  0xdc   : > { %s2782_s10 = scalar_lea.vmem %s3327_s19, 1024  ;;  %s2962_s4 = smov [#allocation10]  }
  0xdd   : > { %p2783_p1 = scmp.ne.s32.totalorder %s3327_s19, %s2782_s10  ;;  %s2787_s0 = sshll.u32 %s2962_s4, 4  ;;  %s2788_s0 = int_to_ptr.vmem [resolvable:$false] %s2787_s0 }
  0xde   : > { %s2789_s29 = scalar_lea.vmem %s2788_s0, 2048  ;;  %p2790_p5 = scmp.lt.s32.totalorder %s3327_s19, %s2788_s0 }
  0xdf   : > { %p2785_p8 = pnand %p2783_p1, %p2769_p10  ;;  %p2791_p0 = scmp.lt.s32.totalorder %s2789_s29, %s2782_s10 }
  0xe1   : > { %p2786_p12 = pneg %p2785_p8  ;;  %p2792_p3 = por %p2791_p0, %p2790_p5 }
  0xe3   : > { %p2793_p4 = pnand %p2792_p3, %p2786_p12 }
  0xe5   : > { %2796 = shalt.err (!%p2793_p4)
}
  0xe6   : > { %2372 = dma.hbm_to_vmem [thread:$0]  (!%p3323_p6), %s3318_s23, 1024, %s3327_s19, %s3329_s1, %s4117_s16, %s4117_s16, %s4116_s7  }
  0xe7   : > { %s4135_s21 = sld [smem:[#allocation31_spill]] }
  0xed   : > { %p4136_p10 = scmp.ne.s32.totalorder %s4135_s21, 0 }
  0xee   : > { %s3363_s5 = sand.u32 (!%p4136_p10), 1, %s2919_s30  }
  0xef   : > { %354 = sbr.rel (%p4136_p10) target bundleno = 1720 (0x6b8), region = 48  ;;  %s2098_s3 = sshll.u32 (!%p4136_p10), %s3363_s5, 7 }
  0xf0   : > { %s357_s18 = scalar_lea.sflag (!%p4136_p10), [#allocation8], %s3363_s5  ;;  %s3367_s24 = scalar_lea.vmem (!%p4136_p10), [#allocation7], %s2098_s3 }
  0xf6   : > { %2878 = dma.done.wait (%p3220_p11), %s357_s18, 2048  }
  0xf7   : > { %2880 = vsyncadd (%p3220_p11), %s357_s18, 4294965248  ;;  %s4137_s22 = sld [smem:[#allocation29_spill]]  ;;  %s4138_s7 = sld [smem:[#allocation30_spill]] }
  0xf8   : > { %s367_s23 = sand.u32 1, %s2907_s27  }
  0xf9   : > { %s2099_s19 = sshll.u32 %s367_s23, 6 }
  0xfa   : > { %s3375_s25 = scalar_lea.vmem [#allocation10], %s2099_s19 }
  0xfd   : > { %s365_s16 = sand.u32 1, %s4137_s22   ;;  %p4139_p6 = scmp.ne.s32.totalorder %s4138_s7, 0 }
  0xfe   : > { %s366_s1 = scalar_lea.sflag [#allocation11], %s365_s16 }
  0xff   : > { %2882 = dma.done.wait (%p4139_p6), %s366_s1, 1024  }
 0x100   : > { %2884 = vsyncadd (%p4139_p6), %s366_s1, 4294966272  ;;  %p4140_p9 = scmp.eq.s32.totalorder %s4137_s22, 0 }
 0x102   : > { %2886 = dma.done.wait (%p4140_p9), [#allocation11], 256   ;;  %p4141_p2 = pmov %p4140_p9 }
 0x104   : > { %2888 = vsyncadd (%p4141_p2), [#allocation11], 4294967040  ;;  %p4142_p11 = pmov %p4141_p2 }
 0x105   : > { %p4143_p13 = pmov %p4141_p2 }
 0x106   : > { %2890 = dma.done.wait (%p4142_p11), [#allocation14], 272  }
 0x107   : > { %2892 = vsyncadd (%p4143_p13), [#allocation14], 4294967024  ;;  %p4144_p7 = pmov %p4141_p2 }
 0x108   : > { %p4145_p1 = pmov %p4141_p2 }
 0x109   : > { %2894 = dma.done.wait (%p4144_p7), [#allocation17], 16  }
 0x10a   : > { %2896 = vsyncadd (%p4145_p1), [#allocation17], 4294967280  ;;  %s3393_s9 = scalar_lea.vmem [#allocation18], %s2098_s3  ;;  %s4146_s15 = sld [smem:[#allocation26_spill]] }
 0x110   : > { %p2105_p8 = scmp.ne.s32.totalorder %s4146_s15, 0 }
 0x111   : > { %v2505_v0 = vld [vmem:[#allocation12] sm:$0xff] (!%p2105_p8)   ;;  %v3396_v1 = vld [vmem:[#allocation12 + $0x8] sm:$0xff] (!%p2105_p8)   ;;  %vm614_vm0 = vcmask (!%p2105_p8), 7168   ;;  %vm476_vm1 = vcmask (!%p2105_p8), 261120   ;;  %v2963_v6 = vmov (!%p2105_p8), -inf   ;;  %v2964_v7 = vmov (!%p2105_p8), 0.0  }
 0x112   : > { %428 = sbr.rel (%p2105_p8) target bundleno = 510 (0x1fe), region = 76  ;;  %2211 = vmatprep.subr.bf16.mxu0 (!%p2105_p8), %v2505_v0  ;;  %2315 = vmatprep.subr.bf16.mxu1 (!%p2105_p8), %v2505_v0  ;;  %v3399_v2 = vld [vmem:[%s3367_s24] sm:$0xff] (!%p2105_p8)  ;;  %v3402_v3 = vld [vmem:[%s3367_s24 + $0x8] sm:$0xff] (!%p2105_p8)  ;;  %615 = vst.msk [vmem:[#allocation3] sm:$0xff] (!%p2105_p8), %vm614_vm0, %v2963_v6  ;;  %616 = vst.msk [vmem:[#allocation3 + $0x8] sm:$0xff] (!%p2105_p8), %vm614_vm0, %v2963_v6 }
 0x113   : > { %v3405_v4 = vld [vmem:[%s3367_s24 + $0x40] sm:$0xff] (!%p2105_p8)  ;;  %2212 = vmatpush3.bf16.msra.mxu0 (!%p2105_p8), %v2505_v0  ;;  %2317 = vmatpush3.bf16.msra.mxu1 (!%p2105_p8), %v2505_v0  ;;  %v445_v5 = vpack.c.bf16 (!%p2105_p8), %v3402_v3, %v3399_v2  ;;  %617 = vst.msk [vmem:[#allocation3 + $0x10] sm:$0xff] (!%p2105_p8), %vm614_vm0, %v2963_v6  ;;  %618 = vst.msk [vmem:[#allocation3 + $0x18] sm:$0xff] (!%p2105_p8), %vm614_vm0, %v2963_v6  ;;  %v438_v8 = vld [vmem:[%s3367_s24 + $0x48] sm:$0xff] (!%p2105_p8) }
 0x114   : > { %619 = vst.msk [vmem:[#allocation3 + $0x20] sm:$0xff] (!%p2105_p8), %vm614_vm0, %v2963_v6  ;;  %620 = vst.msk [vmem:[#allocation3 + $0x28] sm:$0xff] (!%p2105_p8), %vm614_vm0, %v2963_v6  ;;  %v431_v9 = vld [vmem:[%s3367_s24 + $0x10] sm:$0xff] (!%p2105_p8)  ;;  %v432_v10 = vld [vmem:[%s3367_s24 + $0x18] sm:$0xff] (!%p2105_p8)  ;;  %2213 = vmatprep.subr.bf16.mxu0 (!%p2105_p8), %v3396_v1  ;;  %2316 = vmatprep.subr.bf16.mxu1 (!%p2105_p8), %v3396_v1  ;;  %v449_v11 = vpack.c.bf16 (!%p2105_p8), %v438_v8, %v3405_v4 }
 0x115   : > { %621 = vst.msk [vmem:[#allocation3 + $0x30] sm:$0xff] (!%p2105_p8), %vm614_vm0, %v2963_v6  ;;  %622 = vst.msk [vmem:[#allocation3 + $0x38] sm:$0xff] (!%p2105_p8), %vm614_vm0, %v2963_v6  ;;  %v439_v12 = vld [vmem:[%s3367_s24 + $0x50] sm:$0xff] (!%p2105_p8)  ;;  %v440_v13 = vld [vmem:[%s3367_s24 + $0x58] sm:$0xff] (!%p2105_p8)  ;;  %2215 = vmatprep.mubr.msk.bf16.mxu0 (!%p2105_p8), %vm476_vm1, %v445_v5  ;;  %v446_v18 = vpack.c.bf16 (!%p2105_p8), %v432_v10, %v431_v9 }
 0x116   : > { %623 = vst.msk [vmem:[#allocation3 + $0x40] sm:$0xff] (!%p2105_p8), %vm614_vm0, %v2963_v6  ;;  %624 = vst.msk [vmem:[#allocation3 + $0x48] sm:$0xff] (!%p2105_p8), %vm614_vm0, %v2963_v6  ;;  %v433_v14 = vld [vmem:[%s3367_s24 + $0x20] sm:$0xff] (!%p2105_p8)  ;;  %v434_v15 = vld [vmem:[%s3367_s24 + $0x28] sm:$0xff] (!%p2105_p8)  ;;  %2223 = vmatprep.mubr.msk.bf16.mxu1 (!%p2105_p8), %vm476_vm1, %v449_v11  ;;  %v450_v19 = vpack.c.bf16 (!%p2105_p8), %v440_v13, %v439_v12 }
 0x117   : > { %625 = vst.msk [vmem:[#allocation3 + $0x50] sm:$0xff] (!%p2105_p8), %vm614_vm0, %v2963_v6  ;;  %626 = vst.msk [vmem:[#allocation3 + $0x58] sm:$0xff] (!%p2105_p8), %vm614_vm0, %v2963_v6  ;;  %v441_v16 = vld [vmem:[%s3367_s24 + $0x60] sm:$0xff] (!%p2105_p8)  ;;  %v442_v17 = vld [vmem:[%s3367_s24 + $0x68] sm:$0xff] (!%p2105_p8)  ;;  %2214 = vmatpush3.bf16.msra.mxu0 (!%p2105_p8), %v3396_v1  ;;  %2318 = vmatpush3.bf16.msra.mxu1 (!%p2105_p8), %v3396_v1  ;;  %v447_v20 = vpack.c.bf16 (!%p2105_p8), %v434_v15, %v433_v14 }
 0x118   : > { %627 = vst.msk [vmem:[#allocation3 + $0x60] sm:$0xff] (!%p2105_p8), %vm614_vm0, %v2963_v6  ;;  %628 = vst.msk [vmem:[#allocation3 + $0x68] sm:$0xff] (!%p2105_p8), %vm614_vm0, %v2963_v6  ;;  %v451_v21 = vpack.c.bf16 (!%p2105_p8), %v442_v17, %v441_v16  ;;  %v435_v22 = vld [vmem:[%s3367_s24 + $0x30] sm:$0xff] (!%p2105_p8)  ;;  %v436_v23 = vld [vmem:[%s3367_s24 + $0x38] sm:$0xff] (!%p2105_p8) }
 0x119   : > { %629 = vst.msk [vmem:[#allocation3 + $0x70] sm:$0xff] %vm614_vm0, %v2963_v6  ;;  %630 = vst.msk [vmem:[#allocation3 + $0x78] sm:$0xff] %vm614_vm0, %v2963_v6  ;;  %v443_v24 = vld [vmem:[%s3367_s24 + $0x70] sm:$0xff]  ;;  %v444_v25 = vld [vmem:[%s3367_s24 + $0x78] sm:$0xff]  ;;  %v448_v26 = vpack.c.bf16 %v436_v23, %v435_v22 }
 0x11a   : > { %631 = vst.msk [vmem:[#allocation4] sm:$0xff] %vm614_vm0, %v2964_v7  ;;  %632 = vst.msk [vmem:[#allocation4 + $0x8] sm:$0xff] %vm614_vm0, %v2964_v7  ;;  %2216 = vmatmul.mubr.msk.bf16.vlgmr.msra.gmra.mrb[0].mxu0 %vm476_vm1, %v446_v18  ;;  %2224 = vmatmul.mubr.msk.bf16.vlgmr.msra.gmra.mrb[0].mxu1 %vm476_vm1, %v450_v19  ;;  %v452_v27 = vpack.c.bf16 %v444_v25, %v443_v24  ;;  %v2106_v29 = vld [vmem:[#allocation13] ss:$0 sm:$0xff] }
 0x11b   : > { %633 = vst.msk [vmem:[#allocation4 + $0x10] sm:$0xff] %vm614_vm0, %v2964_v7  ;;  %634 = vst.msk [vmem:[#allocation4 + $0x18] sm:$0xff] %vm614_vm0, %v2964_v7  ;;  %2219 = vmatprep.mubr.msk.bf16.mxu0 %vm476_vm1, %v447_v20  ;;  %2227 = vmatprep.mubr.msk.bf16.mxu1 %vm476_vm1, %v451_v21 }
 0x11c   : > { %635 = vst.msk [vmem:[#allocation4 + $0x20] sm:$0xff] %vm614_vm0, %v2964_v7  ;;  %636 = vst.msk [vmem:[#allocation4 + $0x28] sm:$0xff] %vm614_vm0, %v2964_v7 }
 0x11d   : > { %637 = vst.msk [vmem:[#allocation4 + $0x30] sm:$0xff] %vm614_vm0, %v2964_v7  ;;  %638 = vst.msk [vmem:[#allocation4 + $0x38] sm:$0xff] %vm614_vm0, %v2964_v7 }
 0x11e   : > { %639 = vst.msk [vmem:[#allocation4 + $0x40] sm:$0xff] %vm614_vm0, %v2964_v7  ;;  %640 = vst.msk [vmem:[#allocation4 + $0x48] sm:$0xff] %vm614_vm0, %v2964_v7 }
 0x11f   : > { %641 = vst.msk [vmem:[#allocation4 + $0x50] sm:$0xff] %vm614_vm0, %v2964_v7  ;;  %642 = vst.msk [vmem:[#allocation4 + $0x58] sm:$0xff] %vm614_vm0, %v2964_v7 }
 0x120   : > { %643 = vst.msk [vmem:[#allocation4 + $0x60] sm:$0xff] %vm614_vm0, %v2964_v7  ;;  %644 = vst.msk [vmem:[#allocation4 + $0x68] sm:$0xff] %vm614_vm0, %v2964_v7 }
 0x121   : > { %645 = vst.msk [vmem:[#allocation4 + $0x70] sm:$0xff] %vm614_vm0, %v2964_v7  ;;  %646 = vst.msk [vmem:[#allocation4 + $0x78] sm:$0xff] %vm614_vm0, %v2964_v7 }
 0x122   : > { %647 = vst.msk [vmem:[#allocation5] sm:$0xff] %vm476_vm1, %v2964_v7  ;;  %648 = vst.msk [vmem:[#allocation5 + $0x8] sm:$0xff] %vm476_vm1, %v2964_v7  ;;  %2220 = vmatmul.mubr.msk.bf16.gmra.mrb[4].mxu0 %vm476_vm1, %v448_v26  ;;  %2228 = vmatmul.mubr.msk.bf16.gmra.mrb[4].mxu1 %vm476_vm1, %v452_v27 }
 0x123   : > { %649 = vst.msk [vmem:[#allocation5 + $0x10] sm:$0xff] %vm476_vm1, %v2964_v7  ;;  %650 = vst.msk [vmem:[#allocation5 + $0x18] sm:$0xff] %vm476_vm1, %v2964_v7 }
 0x124   : > { %651 = vst.msk [vmem:[#allocation5 + $0x20] sm:$0xff] %vm476_vm1, %v2964_v7  ;;  %652 = vst.msk [vmem:[#allocation5 + $0x28] sm:$0xff] %vm476_vm1, %v2964_v7 }
 0x125   : > { %653 = vst.msk [vmem:[#allocation5 + $0x30] sm:$0xff] %vm476_vm1, %v2964_v7  ;;  %654 = vst.msk [vmem:[#allocation5 + $0x38] sm:$0xff] %vm476_vm1, %v2964_v7 }
 0x126   : > { %655 = vst.msk [vmem:[#allocation5 + $0x40] sm:$0xff] %vm476_vm1, %v2964_v7  ;;  %656 = vst.msk [vmem:[#allocation5 + $0x48] sm:$0xff] %vm476_vm1, %v2964_v7 }
 0x127   : > { %657 = vst.msk [vmem:[#allocation5 + $0x50] sm:$0xff] %vm476_vm1, %v2964_v7  ;;  %658 = vst.msk [vmem:[#allocation5 + $0x58] sm:$0xff] %vm476_vm1, %v2964_v7 }
 0x128   : > { %659 = vst.msk [vmem:[#allocation5 + $0x60] sm:$0xff] %vm476_vm1, %v2964_v7  ;;  %660 = vst.msk [vmem:[#allocation5 + $0x68] sm:$0xff] %vm476_vm1, %v2964_v7 }
 0x129   : > { %661 = vst.msk [vmem:[#allocation5 + $0x70] sm:$0xff] %vm476_vm1, %v2964_v7  ;;  %662 = vst.msk [vmem:[#allocation5 + $0x78] sm:$0xff] %vm476_vm1, %v2964_v7 }
 0x1ed   : > { %v2217_v28 = vpop.f32.mrb[0].mxu0  ;;  %v2225_v30 = vpop.f32.mrb[0].mxu1 }
 0x1ee   : > { %v535_v31 = vpop.f32.mrb[1].mxu0  ;;  %v567_v32 = vpop.f32.mrb[1].mxu1  ;;  %v544_v35 = vadd.f32 %v2217_v28, %v2106_v29  ;;  %v576_v36 = vadd.f32 %v2225_v30, %v2106_v29 }
 0x1ef   : > { %v2218_v33 = vpop.f32.mrb[2].mxu0  ;;  %v2226_v34 = vpop.f32.mrb[2].mxu1  ;;  %v536_v41 = vadd.f32 %v2106_v29, %v535_v31  ;;  %v568_v42 = vadd.f32 %v2106_v29, %v567_v32 }
 0x1f0   : > { %v547_v37 = vadd.f32 %v2218_v33, %v2106_v29  ;;  %v579_v38 = vadd.f32 %v2226_v34, %v2106_v29  ;;  %v538_v39 = vpop.f32.mrb[3].mxu0  ;;  %v570_v40 = vpop.f32.mrb[3].mxu1 }
 0x1f1   : > { %v539_v43 = vadd.f32 %v2106_v29, %v538_v39  ;;  %v571_v44 = vadd.f32 %v2106_v29, %v570_v40 }
 0x1f2   : > { %v599_v45 = vpack.c.bf16 %v547_v37, %v544_v35  ;;  %v603_v46 = vpack.c.bf16 %v579_v38, %v576_v36 }
 0x1f3   : > { %v598_v47 = vpack.c.bf16 %v539_v43, %v536_v41  ;;  %v602_v48 = vpack.c.bf16 %v571_v44, %v568_v42 }
 0x1f4   : > { %607 = vst.msk [vmem:[#allocation2 + $0x8] sm:$0xff] %vm476_vm1, %v599_v45  ;;  %611 = vst.msk [vmem:[#allocation2 + $0x28] sm:$0xff] %vm476_vm1, %v603_v46 }
 0x1f5   : > { %606 = vst.msk [vmem:[#allocation2] sm:$0xff] %vm476_vm1, %v598_v47  ;;  %610 = vst.msk [vmem:[#allocation2 + $0x20] sm:$0xff] %vm476_vm1, %v602_v48  ;;  %v2221_v49 = vpop.f32.mrb[4].mxu0  ;;  %v2229_v50 = vpop.f32.mrb[4].mxu1 }
 0x1f6   : > { %v551_v51 = vpop.f32.mrb[5].mxu0  ;;  %v583_v52 = vpop.f32.mrb[5].mxu1  ;;  %v560_v55 = vadd.f32 %v2221_v49, %v2106_v29  ;;  %v592_v56 = vadd.f32 %v2229_v50, %v2106_v29 }
 0x1f7   : > { %v2222_v53 = vpop.f32.mrb[6].mxu0  ;;  %v2230_v54 = vpop.f32.mrb[6].mxu1  ;;  %v552_v61 = vadd.f32 %v2106_v29, %v551_v51  ;;  %v584_v62 = vadd.f32 %v2106_v29, %v583_v52 }
 0x1f8   : > { %v563_v57 = vadd.f32 %v2222_v53, %v2106_v29  ;;  %v595_v58 = vadd.f32 %v2230_v54, %v2106_v29  ;;  %v554_v59 = vpop.f32.mrb[7].mxu0  ;;  %v586_v60 = vpop.f32.mrb[7].mxu1 }
 0x1f9   : > { %v555_v63 = vadd.f32 %v2106_v29, %v554_v59  ;;  %v587_v0 = vadd.f32 %v2106_v29, %v586_v60 }
 0x1fa   : > { %v601_v1 = vpack.c.bf16 %v563_v57, %v560_v55  ;;  %v605_v2 = vpack.c.bf16 %v595_v58, %v592_v56 }
 0x1fb   : > { %v600_v3 = vpack.c.bf16 %v555_v63, %v552_v61  ;;  %v604_v4 = vpack.c.bf16 %v587_v0, %v584_v62 }
 0x1fc   : > { %609 = vst.msk [vmem:[#allocation2 + $0x18] sm:$0xff] %vm476_vm1, %v601_v1  ;;  %613 = vst.msk [vmem:[#allocation2 + $0x38] sm:$0xff] %vm476_vm1, %v605_v2 }
 0x1fd   : > { %608 = vst.msk [vmem:[#allocation2 + $0x10] sm:$0xff] %vm476_vm1, %v600_v3  ;;  %612 = vst.msk [vmem:[#allocation2 + $0x30] sm:$0xff] %vm476_vm1, %v604_v4 }
 0x1fe PF: > { %v2509_v5 = vld [vmem:[%s3375_s25] sm:$0xff]   ;;  %vm727_vm2 = vcmask 261120   ;;  %v2510_v6 = vld [vmem:[%s3375_s25 + $0x8] sm:$0xff]   ;;  %v2511_v9 = vld [vmem:[%s3375_s25 + $0x10] sm:$0xff]   ;;  %v2965_v38 = vmov 0   ;;  %vm1193_vm3 = vcmask 7168  }
 0x1ff   : > { %2323 = vmatprep.subr.msk.bf16.mxu0 %vm727_vm2, %v2509_v5  ;;  %v753_v7 = vsel %vm727_vm2, %v2509_v5, 0  ;;  %v756_v8 = vsel %vm727_vm2, %v2510_v6, 0  ;;  %v679_v10 = vld [vmem:[#allocation2] sm:$0xff]  ;;  %v759_v11 = vsel %vm727_vm2, %v2511_v9, 0  ;;  %v2512_v12 = vld [vmem:[%s3375_s25 + $0x18] sm:$0xff]   ;;  %v2514_v16 = vld [vmem:[%s3375_s25 + $0x28] sm:$0xff]   ;;  %2508 = vset.pattern.permute.xlu1 %v2965_v38 }
 0x200   : > { %2232 = vmatpush3.bf16.xpose.msra.mxu0 %v753_v7  ;;  %2247 = vmatprep.mubr.msk.bf16.mxu0 %vm727_vm2, %v679_v10  ;;  %v762_v13 = vsel %vm727_vm2, %v2512_v12, 0  ;;  %v2513_v14 = vld [vmem:[%s3375_s25 + $0x20] sm:$0xff]   ;;  %v768_v17 = vsel %vm727_vm2, %v2514_v16, 0  ;;  %v2515_v18 = vld [vmem:[%s3375_s25 + $0x30] sm:$0xff]   ;;  %v2516_v20 = vld [vmem:[%s3375_s25 + $0x38] sm:$0xff]   ;;  %s4147_s20 = sld [smem:[#allocation26_spill]] }
 0x201   : > { %2324 = vmatprep.subr.msk.bf16.mxu0 %vm727_vm2, %v2510_v6  ;;  %v765_v15 = vsel %vm727_vm2, %v2513_v14, 0  ;;  %v771_v19 = vsel %vm727_vm2, %v2515_v18, 0  ;;  %v774_v21 = vsel %vm727_vm2, %v2516_v20, 0  ;;  %v680_v22 = vld [vmem:[#allocation2 + $0x8] sm:$0xff]  ;;  %v683_v25 = vld [vmem:[#allocation2 + $0x20] sm:$0xff]  ;;  %2507 = vset.pattern.permute.xlu0 %v2965_v38  ;;  %v3573_v48 = vld [vmem:[#allocation3 + $0x10] sm:$0xff] }
 0x202   : > { %v684_v26 = vld [vmem:[#allocation2 + $0x28] sm:$0xff]  ;;  %v2517_v46 = vld [vmem:[%s3375_s25] sm:$0xff]   ;;  %v3583_v54 = vld [vmem:[#allocation3 + $0x18] sm:$0xff] }
 0x203   : > { %v682_v24 = vld [vmem:[#allocation2 + $0x18] sm:$0xff]  ;;  %v2518_v47 = vld [vmem:[%s3375_s25 + $0x8] sm:$0xff]   ;;  %2263 = vmatprep.subr.bf16.mxu1 %v2517_v46  ;;  %v3575_v49 = vld [vmem:[#allocation3] sm:$0xff] }
 0x204   : > { %v681_v23 = vld [vmem:[#allocation2 + $0x10] sm:$0xff]  ;;  %v686_v28 = vld [vmem:[#allocation2 + $0x38] sm:$0xff]  ;;  %2264 = vmatpush3.bf16.msra.mxu1 %v2517_v46  ;;  %v3588_v55 = vld [vmem:[#allocation3 + $0x8] sm:$0xff] }
 0x205   : > { %v685_v27 = vld [vmem:[#allocation2 + $0x30] sm:$0xff]  ;;  %2265 = vmatprep.subr.bf16.mxu1 %v2518_v47  ;;  %v3603_v61 = vld [vmem:[#allocation3 + $0x20] sm:$0xff]  ;;  %v2520_v62 = vld [vmem:[%s3375_s25 + $0x18] sm:$0xff]  }
 0x206   : > { %v2519_v56 = vld [vmem:[%s3375_s25 + $0x10] sm:$0xff]   ;;  %v3608_v63 = vld [vmem:[#allocation3 + $0x38] sm:$0xff]  ;;  %v2521_v5 = vld [vmem:[%s3375_s25 + $0x20] sm:$0xff]   ;;  %p2141_p12 = scmp.ne.s32.totalorder %s4147_s20, 1 }
 0x207   : > { %v3617_v4 = vld [vmem:[#allocation3 + $0x30] sm:$0xff]  ;;  %v3622_v6 = vld [vmem:[#allocation3 + $0x28] sm:$0xff]  ;;  %s1839_s10 = sld [smem:[#allocation6]] (!%p2141_p12) }
 0x208   : > { %2234 = vmatpush3.bf16.xpose.msra.mxu0 %v756_v8  ;;  %2266 = vmatpush3.bf16.msra.mxu1 %v2518_v47 }
 0x209   : > { %2325 = vmatprep.subr.msk.bf16.mxu0 %vm727_vm2, %v2511_v9  ;;  %2267 = vmatprep.subr.bf16.mxu1 %v2519_v56 }
 0x20c   : > { %2268 = vmatpush3.bf16.msra.mxu1 %v2519_v56  ;;  %v886_v56 = vld [vmem:[#allocation3 + $0x68] sm:$0xff] }
 0x20d   : > { %2269 = vmatprep.subr.bf16.mxu1 %v2520_v62 }
 0x210   : > { %2236 = vmatpush3.bf16.xpose.msra.mxu0 %v759_v11  ;;  %2270 = vmatpush3.bf16.msra.mxu1 %v2520_v62  ;;  %v3632_v11 = vld [vmem:[#allocation3 + $0x40] sm:$0xff] }
 0x211   : > { %2326 = vmatprep.subr.msk.bf16.mxu0 %vm727_vm2, %v2512_v12  ;;  %2271 = vmatprep.subr.bf16.mxu1 %v2521_v5  ;;  %v2522_v12 = vld [vmem:[%s3375_s25 + $0x28] sm:$0xff]  }
 0x214   : > { %2272 = vmatpush3.bf16.msra.mxu1 %v2521_v5 }
 0x215   : > { %2273 = vmatprep.subr.bf16.mxu1 %v2522_v12 }
 0x218   : > { %2238 = vmatpush3.bf16.xpose.msra.mxu0 %v762_v13  ;;  %v3638_v13 = vld [vmem:[#allocation3 + $0x58] sm:$0xff]  ;;  %2274 = vmatpush3.bf16.msra.mxu1 %v2522_v12 }
 0x219   : > { %2327 = vmatprep.subr.msk.bf16.mxu0 %vm727_vm2, %v2513_v14 }
 0x220   : > { %2240 = vmatpush3.bf16.xpose.msra.mxu0 %v765_v15 }
 0x221   : > { %2328 = vmatprep.subr.msk.bf16.mxu0 %vm727_vm2, %v2514_v16 }
 0x228   : > { %2242 = vmatpush3.bf16.xpose.msra.mxu0 %v768_v17 }
 0x229   : > { %2329 = vmatprep.subr.msk.bf16.mxu0 %vm727_vm2, %v2515_v18  ;;  %v3648_v18 = vld [vmem:[#allocation3 + $0x50] sm:$0xff] }
 0x230   : > { %2244 = vmatpush3.bf16.xpose.msra.mxu0 %v771_v19  ;;  %v2523_v19 = vld [vmem:[%s3375_s25 + $0x30] sm:$0xff]  }
 0x231   : > { %2330 = vmatprep.subr.msk.bf16.mxu0 %vm727_vm2, %v2516_v20  ;;  %v3654_v20 = vld [vmem:[#allocation3 + $0x48] sm:$0xff]  ;;  %2275 = vmatprep.subr.bf16.mxu1 %v2523_v19 }
 0x232   : > { %2276 = vmatpush3.bf16.msra.mxu1 %v2523_v19 }
 0x238   : > { %2246 = vmatpush3.bf16.xpose.msra.mxu0 %v774_v21 }
 0x23f   : > { %2248 = vmatmul.mubr.msk.bf16.vlgmr.msra.gmra.mrb[0].mxu0 %vm727_vm2, %v680_v22 }
 0x240   : > { %2251 = vmatprep.mubr.msk.bf16.mxu0 %vm727_vm2, %v681_v23 }
 0x247   : > { %2252 = vmatmul.mubr.msk.bf16.gmra.mrb[4].mxu0 %vm727_vm2, %v682_v24 }
 0x248   : > { %2255 = vmatprep.mubr.msk.bf16.mxu0 %vm727_vm2, %v683_v25 }
 0x24f   : > { %2256 = vmatmul.mubr.msk.bf16.gmra.mrb[8].mxu0 %vm727_vm2, %v684_v26  ;;  %v3666_v26 = vld [vmem:[#allocation3 + $0x60] sm:$0xff] }
 0x250   : > { %2259 = vmatprep.mubr.msk.bf16.mxu0 %vm727_vm2, %v685_v27  ;;  %v2524_v27 = vld [vmem:[%s3375_s25 + $0x38] sm:$0xff]  }
 0x251   : > { %2277 = vmatprep.subr.bf16.mxu1 %v2524_v27 }
 0x252   : > { %2278 = vmatpush3.bf16.msra.mxu1 %v2524_v27 }
 0x257   : > { %2260 = vmatmul.mubr.msk.bf16.gmra.mrb[12].mxu0 %vm727_vm2, %v686_v28  ;;  %v3672_v28 = vld [vmem:[#allocation3 + $0x78] sm:$0xff] }
 0x312   : > { %v3523_v29 = vpop.f32.mrb[0].mxu0 }
 0x313   : > { %893 = vmax.xlane.f32.xlu1 %v3523_v29  ;;  %v3526_v30 = vpop.f32.mrb[1].mxu0 }
 0x314   : > { %889 = vmax.xlane.f32.xlu0 %v3526_v30  ;;  %v3529_v31 = vpop.f32.mrb[2].mxu0 }
 0x315   : > { %v3531_v32 = vpop.f32.mrb[3].mxu0 }
 0x317   : > { %895 = vmax.xlane.f32.xlu1 %v3529_v31 }
 0x318   : > { %891 = vmax.xlane.f32.xlu0 %v3531_v32 }
 0x31a   : > { %v3535_v33 = vpop.f32.mrb[4].mxu0 }
 0x31b   : > { %v3537_v34 = vpop.f32.mrb[5].mxu0 }
 0x31c   : > { %897 = vmax.xlane.f32.xlu0 %v3537_v34  ;;  %v3540_v35 = vpop.f32.mrb[6].mxu0 }
 0x31d   : > { %903 = vmax.xlane.f32.xlu1 %v3540_v35  ;;  %v3543_v36 = vpop.f32.mrb[7].mxu0 }
 0x320   : > { %901 = vmax.xlane.f32.xlu0 %v3535_v33 }
 0x321   : > { %899 = vmax.xlane.f32.xlu1 %v3543_v36 }
 0x322   : > { %v3547_v37 = vpop.f32.mrb[8].mxu0 }
 0x323   : > { %v3549_v39 = vpop.f32.mrb[9].mxu0 }
 0x324   : > { %v3551_v40 = vpop.f32.mrb[10].mxu0  ;;  %905 = vmax.xlane.f32.xlu0 %v3549_v39 }
 0x325   : > { %911 = vmax.xlane.f32.xlu1 %v3551_v40  ;;  %v3555_v41 = vpop.f32.mrb[11].mxu0 }
 0x328   : > { %909 = vmax.xlane.f32.xlu0 %v3547_v37 }
 0x329   : > { %907 = vmax.xlane.f32.xlu1 %v3555_v41 }
 0x32a   : > { %v3559_v42 = vpop.f32.mrb[12].mxu0 }
 0x32b   : > { %v3561_v43 = vpop.f32.mrb[13].mxu0 }
 0x32c   : > { %v3563_v44 = vpop.f32.mrb[14].mxu0  ;;  %913 = vmax.xlane.f32.xlu0 %v3561_v43 }
 0x32d   : > { %919 = vmax.xlane.f32.xlu1 %v3563_v44  ;;  %v3567_v45 = vpop.f32.mrb[15].mxu0 }
 0x330   : > { %917 = vmax.xlane.f32.xlu0 %v3559_v42 }
 0x331   : > { %915 = vmax.xlane.f32.xlu1 %v3567_v45 }
 0x3a0   : > { %v894_v50 = vpop.xlane.xlu1 %893 }
 0x3a1   : > { %v3578_v51 = vmax.f32 %v3573_v48, %v894_v50  ;;  %v890_v52 = vpop.xlane.xlu0 %889 }
 0x3a2   : > { %v3581_v53 = vmax.f32 %v3575_v49, %v890_v52 }
 0x3a3   : > { %1525 = vst.msk [vmem:[#allocation3 + $0x10] sm:$0xff] %vm1193_vm3, %v3578_v51  ;;  %997 = vperm.xlu1 %2508, %v3578_v51  }
 0x3a4   : > { %1523 = vst.msk [vmem:[#allocation3] sm:$0xff] %vm1193_vm3, %v3581_v53  ;;  %v896_v57 = vpop.xlane.xlu1 %895  ;;  %987 = vperm.xlu0 %2507, %v3581_v53   ;;  %v937_v22 = vsub.f32 %v3575_v49, %v3581_v53  ;;  %v3685_v53 = vld [vmem:[#allocation3 + $0x70] sm:$0xff] }
 0x3a5   : > { %v3595_v58 = vmax.f32 %v3583_v54, %v896_v57  ;;  %v892_v59 = vpop.xlane.xlu0 %891 }
 0x3a6   : > { %v3598_v60 = vmax.f32 %v3588_v55, %v892_v59  ;;  %v953_v46 = vmul.f32 1.442695, %v937_v22 }
 0x3a7   : > { %1526 = vst.msk [vmem:[#allocation3 + $0x18] sm:$0xff] %vm1193_vm3, %v3595_v58  ;;  %1002 = vperm.xlu1 %2508, %v3595_v58   ;;  %v940_v47 = vsub.f32 %v3583_v54, %v3595_v58 }
 0x3a8   : > { %1524 = vst.msk [vmem:[#allocation3 + $0x8] sm:$0xff] %vm1193_vm3, %v3598_v60  ;;  %v938_v57 = vsub.f32 %v3588_v55, %v3598_v60  ;;  %2525 = vpow2.f32 %v953_v46 }
 0x3a9   : > { %v898_v0 = vpop.xlane.xlu0 %897  ;;  %v959_v59 = vmul.f32 1.442695, %v940_v47 }
 0x3aa   : > { %v3611_v1 = vmax.f32 %v3603_v61, %v898_v0  ;;  %v904_v2 = vpop.xlane.xlu1 %903 }
 0x3ab   : > { %v3614_v3 = vmax.f32 %v3608_v63, %v904_v2  ;;  %992 = vperm.xlu1 %2508, %v3598_v60   ;;  %v939_v60 = vsub.f32 %v3573_v48, %v3578_v51  ;;  %2527 = vpow2.f32 %v959_v59 }
 0x3ac   : > { %1527 = vst.msk [vmem:[#allocation3 + $0x20] sm:$0xff] %vm1193_vm3, %v3611_v1  ;;  %v941_v12 = vsub.f32 %v3603_v61, %v3611_v1 }
 0x3ad   : > { %1530 = vst.msk [vmem:[#allocation3 + $0x38] sm:$0xff] %vm1193_vm3, %v3614_v3  ;;  %v902_v7 = vpop.xlane.xlu0 %901 }
 0x3ae   : > { %v3627_v8 = vmax.f32 %v3617_v4, %v902_v7  ;;  %v900_v9 = vpop.xlane.xlu1 %899  ;;  %v955_v7 = vmul.f32 1.442695, %v938_v57 }
 0x3af   : > { %v3630_v10 = vmax.f32 %v3622_v6, %v900_v9 }
 0x3b0   : > { %1529 = vst.msk [vmem:[#allocation3 + $0x30] sm:$0xff] %vm1193_vm3, %v3627_v8  ;;  %1017 = vperm.xlu1 %2508, %v3627_v8   ;;  %2529 = vpow2.f32 %v955_v7 }
 0x3b1   : > { %1528 = vst.msk [vmem:[#allocation3 + $0x28] sm:$0xff] %vm1193_vm3, %v3630_v10  ;;  %v906_v14 = vpop.xlane.xlu0 %905  ;;  %v942_v62 = vsub.f32 %v3622_v6, %v3630_v10  ;;  %v944_v6 = vsub.f32 %v3608_v63, %v3614_v3  ;;  %v961_v63 = vmul.f32 1.442695, %v941_v12 }
 0x3b2   : > { %v912_v15 = vpop.xlane.xlu1 %911  ;;  %v3643_v16 = vmax.f32 %v3632_v11, %v906_v14  ;;  %v3718_v51 = vpop.eup %2525 }
 0x3b3   : > { %v3646_v17 = vmax.f32 %v3638_v13, %v912_v15  ;;  %v963_v9 = vmul.f32 1.442695, %v942_v62  ;;  %v967_v14 = vmul.f32 1.442695, %v944_v6 }
 0x3b4   : > { %1531 = vst.msk [vmem:[#allocation3 + $0x40] sm:$0xff] %vm1193_vm3, %v3643_v16  ;;  %1007 = vperm.xlu1 %2508, %v3611_v1  }
 0x3b5   : > { %1534 = vst.msk [vmem:[#allocation3 + $0x58] sm:$0xff] %vm1193_vm3, %v3646_v17  ;;  %v910_v21 = vpop.xlane.xlu0 %909  ;;  %2531 = vpow2.f32 %v963_v9  ;;  %v948_v48 = vsub.f32 %v3638_v13, %v3646_v17  ;;  %v3726_v15 = vpop.eup %2527 }
 0x3b6   : > { %v908_v23 = vpop.xlane.xlu1 %907  ;;  %v3661_v24 = vmax.f32 %v3648_v18, %v910_v21 }
 0x3b7   : > { %v3664_v25 = vmax.f32 %v3654_v20, %v908_v23  ;;  %v975_v61 = vmul.f32 1.442695, %v948_v48 }
 0x3b8   : > { %1533 = vst.msk [vmem:[#allocation3 + $0x50] sm:$0xff] %vm1193_vm3, %v3661_v24  ;;  %1012 = vperm.xlu1 %2508, %v3630_v10   ;;  %v957_v10 = vmul.f32 1.442695, %v939_v60 }
 0x3b9   : > { %1532 = vst.msk [vmem:[#allocation3 + $0x48] sm:$0xff] %vm1193_vm3, %v3664_v25  ;;  %1032 = vperm.xlu0 %2507, %v3664_v25   ;;  %v914_v38 = vpop.xlane.xlu0 %913  ;;  %v946_v1 = vsub.f32 %v3654_v20, %v3664_v25  ;;  %v945_v20 = vsub.f32 %v3632_v11, %v3643_v16 }
 0x3ba   : > { %v920_v49 = vpop.xlane.xlu1 %919  ;;  %v3680_v50 = vmax.f32 %v3666_v26, %v914_v38  ;;  %2533 = vpow2.f32 %v957_v10  ;;  %v3732_v19 = vpop.eup %2529 }
 0x3bb   : > { %v3683_v52 = vmax.f32 %v3672_v28, %v920_v49  ;;  %2535 = vpow2.f32 %v967_v14  ;;  %v969_v25 = vmul.f32 1.442695, %v945_v20 }
 0x3bc   : > { %1535 = vst.msk [vmem:[#allocation3 + $0x60] sm:$0xff] %vm1193_vm3, %v3680_v50  ;;  %1022 = vperm.xlu1 %2508, %v3614_v3   ;;  %v943_v3 = vsub.f32 %v3617_v4, %v3627_v8  ;;  %2537 = vpow2.f32 %v961_v63  ;;  %v971_v4 = vmul.f32 1.442695, %v946_v1  ;;  %v949_v27 = vsub.f32 %v3666_v26, %v3680_v50 }
 0x3bd   : > { %v952_v54 = vsub.f32 %v3672_v28, %v3683_v52  ;;  %1538 = vst.msk [vmem:[#allocation3 + $0x78] sm:$0xff] %vm1193_vm3, %v3683_v52  ;;  %1042 = vperm.xlu0 %2507, %v3646_v17   ;;  %v918_v58 = vpop.xlane.xlu0 %917  ;;  %v947_v17 = vsub.f32 %v3648_v18, %v3661_v24  ;;  %2539 = vpow2.f32 %v975_v61 }
 0x3be   : > { %v916_v0 = vpop.xlane.xlu1 %915  ;;  %v3700_v2 = vmax.f32 %v3685_v53, %v918_v58  ;;  %v965_v13 = vmul.f32 1.442695, %v943_v3  ;;  %v977_v38 = vmul.f32 1.442695, %v949_v27 }
 0x3bf   : > { %v934_v5 = vmax.f32 %v886_v56, %v916_v0  ;;  %v3734_v21 = vpop.eup %2531  ;;  %v973_v22 = vmul.f32 1.442695, %v947_v17 }
 0x3c0   : > { %v951_v55 = vsub.f32 %v3685_v53, %v3700_v2  ;;  %1537 = vst.msk [vmem:[#allocation3 + $0x70] sm:$0xff] %vm1193_vm3, %v3700_v2  ;;  %1027 = vperm.xlu1 %2508, %v3643_v16   ;;  %2541 = vpow2.f32 %v965_v13 }
 0x3c1   : > { %1536 = vst.msk [vmem:[#allocation3 + $0x68] sm:$0xff] %vm1193_vm3, %v934_v5  ;;  %1052 = vperm.xlu0 %2507, %v934_v5   ;;  %v950_v8 = vsub.f32 %v886_v56, %v934_v5  ;;  %2543 = vpow2.f32 %v971_v4 }
 0x3c2   : > { %2545 = vpow2.f32 %v973_v22 }
 0x3c3   : > { %v979_v18 = vmul.f32 1.442695, %v950_v8 }
 0x3c4   : > { %1037 = vperm.xlu1 %2508, %v3661_v24   ;;  %v3740_v23 = vpop.eup %2533 }
 0x3c5   : > { %1062 = vperm.xlu0 %2507, %v3683_v52   ;;  %v3742_v24 = vpop.eup %2535  ;;  %2547 = vpow2.f32 %v979_v18 }
 0x3c6   : > { %v3748_v11 = vpop.eup %2537  ;;  %2549 = vpow2.f32 %v969_v25 }
 0x3c7   : > { %v3750_v16 = vpop.eup %2539  ;;  %2551 = vpow2.f32 %v977_v38 }
 0x3c8   : > { %1047 = vperm.xlu1 %2508, %v3680_v50  }
 0x3c9   : > { %1228 = vperm.xlu0 %2507, %v3718_v51  }
 0x3ca   : > { %v3754_v46 = vpop.eup %2541 }
 0x3cb   : > { %v3756_v47 = vpop.eup %2543 }
 0x3cc   : > { %1057 = vperm.xlu1 %2508, %v3700_v2   ;;  %v3760_v26 = vpop.eup %2545 }
 0x3cd   : > { %1243 = vperm.xlu0 %2507, %v3726_v15  }
 0x3cf   : > { %v3762_v49 = vpop.eup %2547 }
 0x3d0   : > { %1233 = vperm.xlu1 %2508, %v3732_v19   ;;  %v3766_v50 = vpop.eup %2549 }
 0x3d1   : > { %1253 = vperm.xlu0 %2507, %v3734_v21   ;;  %v3769_v56 = vpop.eup %2551 }
 0x3d4   : > { %1238 = vperm.xlu1 %2508, %v3740_v23  }
 0x3d5   : > { %1263 = vperm.xlu0 %2507, %v3742_v24  }
 0x3d8   : > { %1248 = vperm.xlu1 %2508, %v3748_v11  }
 0x3d9   : > { %1283 = vperm.xlu0 %2507, %v3750_v16  }
 0x3dc   : > { %1258 = vperm.xlu1 %2508, %v3754_v46  }
 0x3dd   : > { %1273 = vperm.xlu0 %2507, %v3756_v47  }
 0x3e0   : > { %1278 = vperm.xlu1 %2508, %v3760_v26  }
 0x3e1   : > { %1293 = vperm.xlu0 %2507, %v3762_v49  }
 0x3e4   : > { %1268 = vperm.xlu1 %2508, %v3766_v50  }
 0x3e8   : > { %1288 = vperm.xlu1 %2508, %v3769_v56  }
 0x422   : > { %v998_v57 = vpop.permute.xlu1 %997 }
 0x423   : > { %v1067_v58 = vsub.f32 %v3523_v29, %v998_v57  ;;  %v988_v59 = vpop.permute.xlu0 %987 }
 0x424   : > { %v1065_v62 = vsub.f32 %v3526_v30, %v988_v59 }
 0x425   : > { %v1085_v0 = vmul.f32 1.442695, %v1067_v58 }
 0x426   : > { %v1081_v5 = vmul.f32 1.442695, %v1065_v62  ;;  %v1003_v60 = vpop.permute.xlu1 %1002 }
 0x427   : > { %2553 = vpow2.f32 %v1085_v0  ;;  %v1068_v7 = vsub.f32 %v3529_v31, %v1003_v60 }
 0x428   : > { %2555 = vpow2.f32 %v1081_v5 }
 0x429   : > { %v1087_v6 = vmul.f32 1.442695, %v1068_v7 }
 0x42a   : > { %v993_v9 = vpop.permute.xlu1 %992 }
 0x42b   : > { %2557 = vpow2.f32 %v1087_v6  ;;  %v1066_v10 = vsub.f32 %v3531_v32, %v993_v9 }
 0x42d   : > { %v1083_v12 = vmul.f32 1.442695, %v1066_v10 }
 0x42f   : > { %2559 = vpow2.f32 %v1083_v12  ;;  %v1018_v14 = vpop.permute.xlu1 %1017 }
 0x430   : > { %v1071_v29 = vsub.f32 %v3535_v33, %v1018_v14 }
 0x431   : > { %v2554_v48 = vpop.eup %2553 }
 0x432   : > { %v2556_v63 = vpop.eup %2555  ;;  %v1093_v30 = vmul.f32 1.442695, %v1071_v29  ;;  %1149 = vadd.xlane.f32.xlu0 %v2554_v48 }
 0x433   : > { %1145 = vadd.xlane.f32.xlu1 %v2556_v63  ;;  %v1008_v3 = vpop.permute.xlu1 %1007 }
 0x434   : > { %2561 = vpow2.f32 %v1093_v30  ;;  %v1069_v31 = vsub.f32 %v3537_v34, %v1008_v3 }
 0x435   : > { %v2558_v61 = vpop.eup %2557 }
 0x436   : > { %v1089_v1 = vmul.f32 1.442695, %v1069_v31  ;;  %v1323_v13 = vpack.c.bf16 %v2558_v61, %v2554_v48 }
 0x437   : > { %1151 = vadd.xlane.f32.xlu1 %v2558_v61  ;;  %v1013_v17 = vpop.permute.xlu1 %1012 }
 0x438   : > { %2563 = vpow2.f32 %v1089_v1  ;;  %v1070_v32 = vsub.f32 %v3543_v36, %v1013_v17  ;;  %v1033_v4 = vpop.permute.xlu0 %1032 }
 0x439   : > { %v2560_v8 = vpop.eup %2559  ;;  %v1074_v22 = vsub.f32 %v3555_v41, %v1033_v4 }
 0x43a   : > { %v1091_v33 = vmul.f32 1.442695, %v1070_v32  ;;  %1147 = vadd.xlane.f32.xlu0 %v2560_v8  ;;  %v1322_v20 = vpack.c.bf16 %v2560_v8, %v2556_v63 }
 0x43b   : > { %v1023_v18 = vpop.permute.xlu1 %1022  ;;  %v1099_v57 = vmul.f32 1.442695, %v1074_v22  ;;  %v981_v22 = vmul.f32 1.442695, %v951_v55 }
 0x43c   : > { %2565 = vpow2.f32 %v1091_v33  ;;  %v1072_v25 = vsub.f32 %v3540_v35, %v1023_v18  ;;  %v1043_v34 = vpop.permute.xlu0 %1042  ;;  %2279 = vmatprep.mubr.bf16.mxu1 %v1322_v20  ;;  %v983_v18 = vmul.f32 1.442695, %v952_v54 }
 0x43d   : > { %2280 = vmatmul.mubr.bf16.vlgmr.msra.gmra.mrb[0].mxu1 %v1323_v13  ;;  %v1076_v58 = vsub.f32 %v3551_v40, %v1043_v34 }
 0x43e   : > { %v2562_v27 = vpop.eup %2561  ;;  %v1095_v38 = vmul.f32 1.442695, %v1072_v25 }
 0x43f   : > { %1157 = vadd.xlane.f32.xlu0 %v2562_v27  ;;  %v1028_v36 = vpop.permute.xlu1 %1027  ;;  %v1103_v5 = vmul.f32 1.442695, %v1076_v58 }
 0x440   : > { %2567 = vpow2.f32 %v1095_v38  ;;  %v1073_v59 = vsub.f32 %v3549_v39, %v1028_v36  ;;  %v1053_v62 = vpop.permute.xlu0 %1052 }
 0x441   : > { %2569 = vpow2.f32 %v1099_v57  ;;  %v1078_v35 = vsub.f32 %v3567_v45, %v1053_v62 }
 0x442   : > { %v2564_v0 = vpop.eup %2563  ;;  %v1097_v41 = vmul.f32 1.442695, %v1073_v59 }
 0x443   : > { %1153 = vadd.xlane.f32.xlu0 %v2564_v0  ;;  %v1038_v60 = vpop.permute.xlu1 %1037  ;;  %v1107_v10 = vmul.f32 1.442695, %v1078_v35 }
 0x444   : > { %2571 = vpow2.f32 %v1097_v41  ;;  %v1075_v7 = vsub.f32 %v3547_v37, %v1038_v60  ;;  %v1063_v6 = vpop.permute.xlu0 %1062 }
 0x445   : > { %2573 = vpow2.f32 %v1103_v5  ;;  %v1080_v12 = vsub.f32 %v3563_v44, %v1063_v6  ;;  %v1113_v5 = vld [vmem:[#allocation4] sm:$0xff] }
 0x446   : > { %v2566_v9 = vpop.eup %2565  ;;  %v1101_v40 = vmul.f32 1.442695, %v1075_v7  ;;  %v1129_v7 = vmul.f32 %v3718_v51, %v1113_v5  ;;  %v1119_v51 = vld [vmem:[#allocation4 + $0x30] sm:$0xff] }
 0x447   : > { %v1048_v39 = vpop.permute.xlu1 %1047  ;;  %v1324_v14 = vpack.c.bf16 %v2566_v9, %v2564_v0  ;;  %v1111_v63 = vmul.f32 1.442695, %v1080_v12  ;;  %v1115_v0 = vld [vmem:[#allocation4 + $0x10] sm:$0xff] }
 0x448   : > { %2575 = vpow2.f32 %v1101_v40  ;;  %v1077_v29 = vsub.f32 %v3561_v43, %v1048_v39  ;;  %v1131_v35 = vmul.f32 %v3740_v23, %v1115_v0  ;;  %v1116_v40 = vld [vmem:[#allocation4 + $0x18] sm:$0xff]  ;;  %v1114_v39 = vld [vmem:[#allocation4 + $0x8] sm:$0xff] }
 0x449   : > { %2283 = vmatprep.mubr.bf16.mxu1 %v1324_v14  ;;  %2577 = vpow2.f32 %v1107_v10  ;;  %v1132_v12 = vmul.f32 %v3726_v15, %v1116_v40 }
 0x44a   : > { %v2568_v48 = vpop.eup %2567  ;;  %v1105_v45 = vmul.f32 1.442695, %v1077_v29 }
 0x44b   : > { %1159 = vadd.xlane.f32.xlu1 %v2568_v48  ;;  %v1058_v30 = vpop.permute.xlu1 %1057  ;;  %v1325_v37 = vpack.c.bf16 %v2568_v48, %v2562_v27  ;;  %v2570_v31 = vpop.eup %2569  ;;  %v1130_v48 = vmul.f32 %v3732_v19, %v1114_v39  ;;  %v1120_v19 = vld [vmem:[#allocation4 + $0x38] sm:$0xff]  ;;  %v1125_v39 = vld [vmem:[#allocation4 + $0x60] sm:$0xff] }
 0x44c   : > { %2579 = vpow2.f32 %v1105_v45  ;;  %v1079_v3 = vsub.f32 %v3559_v42, %v1058_v30  ;;  %v3800_v27 = vpop.permute.xlu0 %1228 }
 0x44d   : > { %2284 = vmatmul.mubr.bf16.gmra.mrb[4].mxu1 %v1325_v37  ;;  %2581 = vpow2.f32 %v1111_v63  ;;  %v1135_v63 = vmul.f32 %v3754_v46, %v1119_v51  ;;  %v1117_v37 = vld [vmem:[#allocation4 + $0x20] sm:$0xff] }
 0x44e   : > { %v2572_v61 = vpop.eup %2571  ;;  %v1109_v44 = vmul.f32 1.442695, %v1079_v3  ;;  %v1133_v15 = vmul.f32 %v3748_v11, %v1117_v37  ;;  %v1211_v37 = vld [vmem:[#allocation5 + $0x8] sm:$0xff] }
 0x44f   : > { %1155 = vadd.xlane.f32.xlu1 %v2566_v9  ;;  %v1326_v1 = vpack.c.bf16 %v2570_v31, %v2572_v61  ;;  %v2574_v43 = vpop.eup %2573  ;;  %v3802_v38 = vpop.permute.xlu1 %1233 }
 0x450   : > { %2583 = vpow2.f32 %v1109_v44  ;;  %v3804_v53 = vpop.permute.xlu0 %1243  ;;  %v1136_v44 = vmul.f32 %v3742_v24, %v1120_v19  ;;  %v1121_v24 = vld [vmem:[#allocation4 + $0x40] sm:$0xff]  ;;  %v1307_v19 = vmul.f32 %v3802_v38, %v1211_v37 }
 0x451   : > { %2287 = vmatprep.mubr.bf16.mxu1 %v1326_v1  ;;  %2585 = vpow2.f32 %v981_v22  ;;  %v1122_v22 = vld [vmem:[#allocation4 + $0x48] sm:$0xff] }
 0x452   : > { %v2576_v13 = vpop.eup %2575  ;;  %2587 = vpow2.f32 %v983_v18  ;;  %v1138_v5 = vmul.f32 %v3756_v47, %v1122_v22 }
 0x453   : > { %1167 = vadd.xlane.f32.xlu1 %v2574_v43  ;;  %1165 = vadd.xlane.f32.xlu0 %v2576_v13  ;;  %v1327_v17 = vpack.c.bf16 %v2574_v43, %v2576_v13  ;;  %v2578_v32 = vpop.eup %2577  ;;  %v3806_v2 = vpop.permute.xlu1 %1238  ;;  %v1118_v43 = vld [vmem:[#allocation4 + $0x28] sm:$0xff] }
 0x454   : > { %v3808_v55 = vpop.permute.xlu0 %1253  ;;  %v1134_v46 = vmul.f32 %v3734_v21, %v1118_v43  ;;  %v1137_v21 = vmul.f32 %v3766_v50, %v1121_v24  ;;  %v1126_v50 = vld [vmem:[#allocation4 + $0x68] sm:$0xff] }
 0x455   : > { %2288 = vmatmul.mubr.bf16.gmra.mrb[8].mxu1 %v1327_v17 }
 0x456   : > { %v2580_v4 = vpop.eup %2579 }
 0x457   : > { %1163 = vadd.xlane.f32.xlu1 %v2570_v31  ;;  %1161 = vadd.xlane.f32.xlu0 %v2572_v61  ;;  %v1328_v42 = vpack.c.bf16 %v2578_v32, %v2580_v4  ;;  %v2582_v8 = vpop.eup %2581  ;;  %v3810_v28 = vpop.permute.xlu1 %1248 }
 0x458   : > { %v3812_v52 = vpop.permute.xlu0 %1263 }
 0x459   : > { %2291 = vmatprep.mubr.bf16.mxu1 %v1328_v42 }
 0x45a   : > { %v2584_v33 = vpop.eup %2583 }
 0x45b   : > { %1175 = vadd.xlane.f32.xlu1 %v2582_v8  ;;  %1173 = vadd.xlane.f32.xlu0 %v2584_v33  ;;  %v1329_v20 = vpack.c.bf16 %v2582_v8, %v2584_v33  ;;  %v3794_v25 = vpop.eup %2585  ;;  %v3814_v54 = vpop.permute.xlu1 %1258 }
 0x45c   : > { %v3797_v34 = vpop.eup %2587  ;;  %v3816_v57 = vpop.permute.xlu0 %1283 }
 0x45d   : > { %2292 = vmatmul.mubr.bf16.gmra.mrb[12].mxu1 %v1329_v20 }
 0x45f   : > { %1171 = vadd.xlane.f32.xlu1 %v2578_v32  ;;  %1169 = vadd.xlane.f32.xlu0 %v2580_v4  ;;  %v3818_v58 = vpop.permute.xlu1 %1278  ;;  %v1123_v32 = vld [vmem:[#allocation4 + $0x50] sm:$0xff]  ;;  %v1124_v4 = vld [vmem:[#allocation4 + $0x58] sm:$0xff] }
 0x460   : > { %v3820_v36 = vpop.permute.xlu0 %1273  ;;  %v1139_v11 = vmul.f32 %v3760_v26, %v1123_v32  ;;  %v1140_v8 = vmul.f32 %v3750_v16, %v1124_v4  ;;  %v1128_v26 = vld [vmem:[#allocation4 + $0x78] sm:$0xff] }
 0x461   : > { %v1144_v40 = vmul.f32 %v3797_v34, %v1128_v26 }
 0x463   : > { %v3822_v59 = vpop.permute.xlu1 %1268 }
 0x464   : > { %v3824_v62 = vpop.permute.xlu0 %1293 }
 0x467   : > { %v3826_v41 = vpop.permute.xlu1 %1288 }
 0x470   : > { %1298 = vperm.xlu1 %2508, %v3794_v25  }
 0x475   : > { %1303 = vperm.xlu0 %2507, %v3797_v34   ;;  %v1212_v34 = vld [vmem:[#allocation5 + $0x10] sm:$0xff] }
 0x4bf   : > { %v1150_v60 = vpop.xlane.xlu0 %1149 }
 0x4c0   : > { %v1179_v6 = vadd.f32 %v1150_v60, %v1131_v35  ;;  %v1146_v9 = vpop.xlane.xlu1 %1145 }
 0x4c1   : > { %v1177_v10 = vadd.f32 %v1146_v9, %v1129_v7  ;;  %v1127_v7 = vld [vmem:[#allocation4 + $0x70] sm:$0xff] }
 0x4c2   : > { %1196 = vst.msk [vmem:[#allocation4 + $0x10] sm:$0xff] %vm1193_vm3, %v1179_v6  ;;  %v1143_v9 = vmul.f32 %v3794_v25, %v1127_v7 }
 0x4c3   : > { %1194 = vst.msk [vmem:[#allocation4] sm:$0xff] %vm1193_vm3, %v1177_v10 }
 0x4c4   : > { %v1152_v14 = vpop.xlane.xlu1 %1151 }
 0x4c5   : > { %v1180_v29 = vadd.f32 %v1152_v14, %v1132_v12 }
 0x4c7   : > { %1197 = vst.msk [vmem:[#allocation4 + $0x18] sm:$0xff] %vm1193_vm3, %v1180_v29  ;;  %v1148_v23 = vpop.xlane.xlu0 %1147  ;;  %v1141_v29 = vmul.f32 %v3769_v56, %v1125_v39 }
 0x4c8   : > { %v1178_v45 = vadd.f32 %v1148_v23, %v1130_v48  ;;  %v1142_v48 = vmul.f32 %v3762_v49, %v1126_v50  ;;  %v1222_v50 = vld [vmem:[#allocation5 + $0x60] sm:$0xff] }
 0x4ca   : > { %1195 = vst.msk [vmem:[#allocation4 + $0x8] sm:$0xff] %vm1193_vm3, %v1178_v45 }
 0x4cc   : > { %v1158_v30 = vpop.xlane.xlu0 %1157 }
 0x4cd   : > { %v1183_v3 = vadd.f32 %v1158_v30, %v1135_v63  ;;  %v1210_v63 = vld [vmem:[#allocation5] sm:$0xff]  ;;  %v1213_v30 = vld [vmem:[#allocation5 + $0x18] sm:$0xff] }
 0x4ce   : > { %v1309_v56 = vmul.f32 %v3804_v53, %v1213_v30  ;;  %v1217_v53 = vld [vmem:[#allocation5 + $0x38] sm:$0xff] }
 0x4cf   : > { %1200 = vst.msk [vmem:[#allocation4 + $0x30] sm:$0xff] %vm1193_vm3, %v1183_v3  ;;  %v1308_v3 = vmul.f32 %v3806_v2, %v1212_v34  ;;  %v1214_v2 = vld [vmem:[#allocation5 + $0x20] sm:$0xff] }
 0x4d0   : > { %v1154_v31 = vpop.xlane.xlu0 %1153  ;;  %v1310_v38 = vmul.f32 %v3810_v28, %v1214_v2  ;;  %v1221_v28 = vld [vmem:[#allocation5 + $0x58] sm:$0xff] }
 0x4d1   : > { %v1181_v61 = vadd.f32 %v1154_v31, %v1133_v15  ;;  %v1306_v15 = vmul.f32 %v3800_v27, %v1210_v63  ;;  %v1216_v27 = vld [vmem:[#allocation5 + $0x30] sm:$0xff] }
 0x4d2   : > { %v1312_v32 = vmul.f32 %v3814_v54, %v1216_v27  ;;  %v1218_v54 = vld [vmem:[#allocation5 + $0x40] sm:$0xff]  ;;  %v2591_v2 = vld [vmem:[#allocation15] sm:$0xff] (!%p2141_p12)  }
 0x4d3   : > { %1198 = vst.msk [vmem:[#allocation4 + $0x20] sm:$0xff] %vm1193_vm3, %v1181_v61  ;;  %2295 = vmatprep.subr.bf16.mxu0 (!%p2141_p12), %v2591_v2  ;;  %2319 = vmatprep.subr.bf16.mxu1 (!%p2141_p12), %v2591_v2 }
 0x4d4   : > { %2296 = vmatpush3.bf16.msra.mxu0 (!%p2141_p12), %v2591_v2  ;;  %2321 = vmatpush3.bf16.msra.mxu1 (!%p2141_p12), %v2591_v2 }
 0x4d8   : > { %v1160_v1 = vpop.xlane.xlu1 %1159 }
 0x4d9   : > { %v1184_v13 = vadd.f32 %v1160_v1, %v1136_v44 }
 0x4db   : > { %1201 = vst.msk [vmem:[#allocation4 + $0x38] sm:$0xff] %vm1193_vm3, %v1184_v13 }
 0x4dc   : > { %v1156_v17 = vpop.xlane.xlu1 %1155 }
 0x4dd   : > { %v1182_v42 = vadd.f32 %v1156_v17, %v1134_v46  ;;  %v1215_v17 = vld [vmem:[#allocation5 + $0x28] sm:$0xff] }
 0x4df   : > { %1199 = vst.msk [vmem:[#allocation4 + $0x28] sm:$0xff] %vm1193_vm3, %v1182_v42  ;;  %v1313_v42 = vmul.f32 %v3812_v52, %v1217_v53  ;;  %v1219_v52 = vld [vmem:[#allocation5 + $0x48] sm:$0xff] }
 0x4e0   : > { %v1166_v33 = vpop.xlane.xlu0 %1165  ;;  %v1168_v20 = vpop.xlane.xlu1 %1167 }
 0x4e1   : > { %v1187_v18 = vadd.f32 %v1166_v33, %v1139_v11  ;;  %v1188_v0 = vadd.f32 %v1168_v20, %v1140_v8  ;;  %v1311_v33 = vmul.f32 %v3808_v55, %v1215_v17  ;;  %v1314_v55 = vmul.f32 %v3822_v59, %v1218_v54  ;;  %v1225_v59 = vld [vmem:[#allocation5 + $0x78] sm:$0xff] }
 0x4e3   : > { %1204 = vst.msk [vmem:[#allocation4 + $0x50] sm:$0xff] %vm1193_vm3, %v1187_v18  ;;  %1205 = vst.msk [vmem:[#allocation4 + $0x58] sm:$0xff] %vm1193_vm3, %v1188_v0  ;;  %v1220_v0 = vld [vmem:[#allocation5 + $0x50] sm:$0xff] }
 0x4e4   : > { %v1162_v35 = vpop.xlane.xlu0 %1161  ;;  %v1164_v60 = vpop.xlane.xlu1 %1163 }
 0x4e5   : > { %v1185_v6 = vadd.f32 %v1162_v35, %v1137_v21  ;;  %v1186_v16 = vadd.f32 %v1164_v60, %v1138_v5  ;;  %v1316_v5 = vmul.f32 %v3818_v58, %v1220_v0  ;;  %v1317_v60 = vmul.f32 %v3816_v57, %v1221_v28 }
 0x4e7   : > { %1202 = vst.msk [vmem:[#allocation4 + $0x40] sm:$0xff] %vm1193_vm3, %v1185_v6  ;;  %1203 = vst.msk [vmem:[#allocation4 + $0x48] sm:$0xff] %vm1193_vm3, %v1186_v16  ;;  %v1315_v6 = vmul.f32 %v3820_v36, %v1219_v52 }
 0x4e8   : > { %v1174_v10 = vpop.xlane.xlu0 %1173  ;;  %v1176_v12 = vpop.xlane.xlu1 %1175 }
 0x4e9   : > { %v1191_v14 = vadd.f32 %v1174_v10, %v1143_v9  ;;  %v1192_v47 = vadd.f32 %v1176_v12, %v1144_v40  ;;  %v1224_v12 = vld [vmem:[#allocation5 + $0x70] sm:$0xff] }
 0x4eb   : > { %1208 = vst.msk [vmem:[#allocation4 + $0x70] sm:$0xff] %vm1193_vm3, %v1191_v14  ;;  %1209 = vst.msk [vmem:[#allocation4 + $0x78] sm:$0xff] %vm1193_vm3, %v1192_v47  ;;  %v1223_v14 = vld [vmem:[#allocation5 + $0x68] sm:$0xff]  ;;  %v1318_v47 = vmul.f32 %v3826_v41, %v1222_v50 }
 0x4ec   : > { %v1170_v23 = vpop.xlane.xlu0 %1169  ;;  %v1172_v45 = vpop.xlane.xlu1 %1171 }
 0x4ed   : > { %v1189_v51 = vadd.f32 %v1170_v23, %v1141_v29  ;;  %v1190_v25 = vadd.f32 %v1172_v45, %v1142_v48 }
 0x4ee   : > { %v1567_v41 = vld [vmem:[#allocation4 + $0x40] sm:$0xff] (!%p2141_p12) }
 0x4ef   : > { %1206 = vst.msk [vmem:[#allocation4 + $0x60] sm:$0xff] %vm1193_vm3, %v1189_v51  ;;  %1207 = vst.msk [vmem:[#allocation4 + $0x68] sm:$0xff] %vm1193_vm3, %v1190_v25  ;;  %v1319_v51 = vmul.f32 %v3824_v62, %v1223_v14  ;;  %v2966_v62 = vmov (!%p2141_p12), 0   ;;  %2593 = vrcp.f32 (!%p2141_p12), %v1567_v41 }
 0x4f0   : > { %v1299_v39 = vpop.permute.xlu1 %1298  ;;  %2590 = vset.pattern.permute.xlu1 (!%p2141_p12), %v2966_v62  ;;  %2589 = vset.pattern.permute.xlu0 (!%p2141_p12), %v2966_v62 }
 0x4f1   : > { %v1320_v36 = vmul.f32 %v1299_v39, %v1224_v12 }
 0x4f4   : > { %v1304_v57 = vpop.permute.xlu0 %1303 }
 0x4f5   : > { %v1321_v48 = vmul.f32 %v1304_v57, %v1225_v59 }
 0x4f6   : > { %v1572_v53 = vld [vmem:[#allocation4 + $0x68] sm:$0xff] (!%p2141_p12) }
 0x510   : > { %v2281_v31 = vpop.f32.mrb[0].mxu1 }
 0x511   : > { %v1493_v49 = vadd.f32 %v2281_v31, %v1308_v3  ;;  %v1428_v61 = vpop.f32.mrb[1].mxu1  ;;  %v1559_v3 = vld [vmem:[#allocation4] sm:$0xff] (!%p2141_p12)  ;;  %v1560_v31 = vld [vmem:[#allocation4 + $0x8] sm:$0xff] (!%p2141_p12) }
 0x512   : > { %v1491_v44 = vadd.f32 %v1428_v61, %v1306_v15  ;;  %v2282_v1 = vpop.f32.mrb[2].mxu1  ;;  %v1568_v15 = vld [vmem:[#allocation4 + $0x48] sm:$0xff] (!%p2141_p12)  ;;  %2595 = vrcp.f32 (!%p2141_p12), %v1559_v3  ;;  %v1570_v61 = vld [vmem:[#allocation4 + $0x58] sm:$0xff] (!%p2141_p12) }
 0x513   : > { %1509 = vst.msk [vmem:[#allocation5 + $0x10] sm:$0xff] %vm727_vm2, %v1493_v49  ;;  %v1494_v43 = vadd.f32 %v2282_v1, %v1309_v56  ;;  %v1431_v13 = vpop.f32.mrb[3].mxu1  ;;  %2597 = vrcp.f32 (!%p2141_p12), %v1568_v15  ;;  %v1562_v56 = vld [vmem:[#allocation4 + $0x18] sm:$0xff] (!%p2141_p12)  ;;  %v1561_v49 = vld [vmem:[#allocation4 + $0x10] sm:$0xff] (!%p2141_p12) }
 0x514   : > { %1507 = vst.msk [vmem:[#allocation5] sm:$0xff] %vm727_vm2, %v1491_v44  ;;  %v1492_v46 = vadd.f32 %v1431_v13, %v1307_v19  ;;  %2599 = vrcp.f32 (!%p2141_p12), %v1560_v31  ;;  %v1569_v19 = vld [vmem:[#allocation4 + $0x50] sm:$0xff] (!%p2141_p12)  ;;  %v2594_v44 = vpop.eup (!%p2141_p12), %2593 }
 0x515   : > { %1510 = vst.msk [vmem:[#allocation5 + $0x18] sm:$0xff] %vm727_vm2, %v1494_v43  ;;  %2601 = vrcp.f32 (!%p2141_p12), %v1562_v56  ;;  %1633 = vperm.xlu1 (!%p2141_p12), %2590, %v2594_v44   ;;  %v1564_v43 = vld [vmem:[#allocation4 + $0x28] sm:$0xff] (!%p2141_p12) }
 0x516   : > { %1508 = vst.msk [vmem:[#allocation5 + $0x8] sm:$0xff] %vm727_vm2, %v1492_v46  ;;  %2603 = vrcp.f32 (!%p2141_p12), %v1561_v49  ;;  %v1563_v46 = vld [vmem:[#allocation4 + $0x20] sm:$0xff] (!%p2141_p12) }
 0x517   : > { %2605 = vrcp.f32 (!%p2141_p12), %v1570_v61 }
 0x518   : > { %2607 = vrcp.f32 (!%p2141_p12), %v1569_v19 }
 0x519   : > { %2609 = vrcp.f32 (!%p2141_p12), %v1564_v43 }
 0x51a   : > { %2611 = vrcp.f32 (!%p2141_p12), %v1563_v46  ;;  %v1545_v50 = vld [vmem:[#allocation5 + $0x10] sm:$0xff] (!%p2141_p12) }
 0x51b   : > { %2613 = vrcp.f32 (!%p2141_p12), %v1572_v53 }
 0x51c   : > { %v2596_v1 = vpop.eup (!%p2141_p12), %2595 }
 0x51d   : > { %v2598_v13 = vpop.eup (!%p2141_p12), %2597  ;;  %1593 = vperm.xlu0 (!%p2141_p12), %2589, %v2596_v1  }
 0x51e   : > { %v2600_v27 = vpop.eup (!%p2141_p12), %2599  ;;  %1638 = vperm.xlu1 (!%p2141_p12), %2590, %v2598_v13  }
 0x51f   : > { %v2602_v17 = vpop.eup (!%p2141_p12), %2601 }
 0x520   : > { %v2285_v4 = vpop.f32.mrb[4].mxu1 }
 0x521   : > { %v1497_v11 = vadd.f32 %v2285_v4, %v1312_v32  ;;  %v1444_v8 = vpop.f32.mrb[5].mxu1  ;;  %1598 = vperm.xlu0 (!%p2141_p12), %2589, %v2600_v27   ;;  %v1571_v32 = vld [vmem:[#allocation4 + $0x60] sm:$0xff] (!%p2141_p12) }
 0x522   : > { %v1495_v20 = vadd.f32 %v1444_v8, %v1310_v38  ;;  %v2286_v24 = vpop.f32.mrb[6].mxu1  ;;  %v2604_v38 = vpop.eup (!%p2141_p12), %2603  ;;  %v2592_v4 = vld [vmem:[#allocation15 + $0x8] sm:$0xff] (!%p2141_p12)   ;;  %1608 = vperm.xlu1 (!%p2141_p12), %2590, %v2602_v17   ;;  %2615 = vrcp.f32 (!%p2141_p12), %v1571_v32  ;;  %v1565_v8 = vld [vmem:[#allocation4 + $0x30] sm:$0xff] (!%p2141_p12) }
 0x523   : > { %1513 = vst.msk [vmem:[#allocation5 + $0x30] sm:$0xff] %vm727_vm2, %v1497_v11  ;;  %v1498_v22 = vadd.f32 %v2286_v24, %v1313_v42  ;;  %v1447_v18 = vpop.f32.mrb[7].mxu1  ;;  %v1566_v42 = vld [vmem:[#allocation4 + $0x38] sm:$0xff] (!%p2141_p12)  ;;  %v2606_v11 = vpop.eup (!%p2141_p12), %2605  ;;  %2297 = vmatprep.subr.bf16.mxu0 (!%p2141_p12), %v2592_v4  ;;  %2320 = vmatprep.subr.bf16.mxu1 (!%p2141_p12), %v2592_v4 }
 0x524   : > { %1511 = vst.msk [vmem:[#allocation5 + $0x20] sm:$0xff] %vm727_vm2, %v1495_v20  ;;  %v1496_v21 = vadd.f32 %v1447_v18, %v1311_v33  ;;  %v2608_v33 = vpop.eup (!%p2141_p12), %2607  ;;  %2298 = vmatpush3.bf16.msra.mxu0 (!%p2141_p12), %v2592_v4  ;;  %2617 = vrcp.f32 (!%p2141_p12), %v1566_v42  ;;  %2322 = vmatpush3.bf16.msra.mxu1 (!%p2141_p12), %v2592_v4  ;;  %v1574_v20 = vld [vmem:[#allocation4 + $0x78] sm:$0xff] (!%p2141_p12) }
 0x525   : > { %1514 = vst.msk [vmem:[#allocation5 + $0x38] sm:$0xff] %vm727_vm2, %v1498_v22  ;;  %1603 = vperm.xlu0 (!%p2141_p12), %2589, %v2604_v38   ;;  %2619 = vrcp.f32 (!%p2141_p12), %v1565_v8  ;;  %v2610_v24 = vpop.eup (!%p2141_p12), %2609  ;;  %v1573_v22 = vld [vmem:[#allocation4 + $0x70] sm:$0xff] (!%p2141_p12) }
 0x526   : > { %1512 = vst.msk [vmem:[#allocation5 + $0x28] sm:$0xff] %vm727_vm2, %v1496_v21  ;;  %1648 = vperm.xlu1 (!%p2141_p12), %2590, %v2606_v11   ;;  %v2612_v18 = vpop.eup (!%p2141_p12), %2611  ;;  %2621 = vrcp.f32 (!%p2141_p12), %v1574_v20 }
 0x527   : > { %2623 = vrcp.f32 (!%p2141_p12), %v1573_v22  ;;  %v2614_v0 = vpop.eup (!%p2141_p12), %2613  ;;  %v3899_v22 = vld [vmem:[#allocation16] ss:$0 sm:$0xff] (!%p2141_p12) }
 0x528   : > { %v2289_v35 = vpop.f32.mrb[8].mxu1 }
 0x529   : > { %v1501_v7 = vadd.f32 %v2289_v35, %v1316_v5  ;;  %v1460_v26 = vpop.f32.mrb[9].mxu1  ;;  %1643 = vperm.xlu0 (!%p2141_p12), %2589, %v2608_v33  }
 0x52a   : > { %v1499_v16 = vadd.f32 %v1460_v26, %v1314_v55  ;;  %v2290_v9 = vpop.f32.mrb[10].mxu1  ;;  %1618 = vperm.xlu1 (!%p2141_p12), %2590, %v2610_v24   ;;  %v1543_v26 = vld [vmem:[#allocation5] sm:$0xff] (!%p2141_p12)  ;;  %v1549_v46 = vld [vmem:[#allocation5 + $0x30] sm:$0xff] (!%p2141_p12) }
 0x52b   : > { %1517 = vst.msk [vmem:[#allocation5 + $0x50] sm:$0xff] %vm727_vm2, %v1501_v7  ;;  %v1502_v40 = vadd.f32 %v2290_v9, %v1317_v60  ;;  %v1463_v10 = vpop.f32.mrb[11].mxu1 }
 0x52c   : > { %1515 = vst.msk [vmem:[#allocation5 + $0x40] sm:$0xff] %vm727_vm2, %v1499_v16  ;;  %v1500_v58 = vadd.f32 %v1463_v10, %v1315_v6  ;;  %v2616_v21 = vpop.eup (!%p2141_p12), %2615  ;;  %v1544_v6 = vld [vmem:[#allocation5 + $0x8] sm:$0xff] (!%p2141_p12)  ;;  %v1550_v13 = vld [vmem:[#allocation5 + $0x38] sm:$0xff] (!%p2141_p12) }
 0x52d   : > { %1518 = vst.msk [vmem:[#allocation5 + $0x58] sm:$0xff] %vm727_vm2, %v1502_v40  ;;  %1613 = vperm.xlu0 (!%p2141_p12), %2589, %v2612_v18  }
 0x52e   : > { %1516 = vst.msk [vmem:[#allocation5 + $0x48] sm:$0xff] %vm727_vm2, %v1500_v58  ;;  %1658 = vperm.xlu1 (!%p2141_p12), %2590, %v2614_v0   ;;  %v2618_v54 = vpop.eup (!%p2141_p12), %2617  ;;  %v1546_v58 = vld [vmem:[#allocation5 + $0x18] sm:$0xff] (!%p2141_p12)  ;;  %v3901_v0 = vstv (!%p2141_p12), %s1839_s10 }
 0x52f   : > { %v2620_v28 = vpop.eup (!%p2141_p12), %2619 }
 0x530   : > { %v2293_v29 = vpop.f32.mrb[12].mxu1  ;;  %1542 = sbr.rel (%p2141_p12) target bundleno = 1691 (0x69b), region = 80  ;;  %v2622_v52 = vpop.eup (!%p2141_p12), %2621 }
 0x531   : > { %v1505_v23 = vadd.f32 %v2293_v29, %v1320_v36  ;;  %v1476_v45 = vpop.f32.mrb[13].mxu1  ;;  %1653 = vperm.xlu0 (!%p2141_p12), %2589, %v2616_v21   ;;  %v2624_v5 = vpop.eup (!%p2141_p12), %2623 }
 0x532   : > { %v1503_v25 = vadd.f32 %v1476_v45, %v1318_v47  ;;  %v2294_v34 = vpop.f32.mrb[14].mxu1  ;;  %1628 = vperm.xlu1 (!%p2141_p12), %2590, %v2618_v54  }
 0x533   : > { %1521 = vst.msk [vmem:[#allocation5 + $0x70] sm:$0xff] %vm727_vm2, %v1505_v23  ;;  %v1506_v63 = vadd.f32 %v2294_v34, %v1321_v48  ;;  %v1479_v30 = vpop.f32.mrb[15].mxu1  ;;  %v1551_v60 = vld [vmem:[#allocation5 + $0x40] sm:$0xff] (!%p2141_p12)  ;;  %v1553_v23 = vld [vmem:[#allocation5 + $0x50] sm:$0xff] (!%p2141_p12) }
 0x534   : > { %1519 = vst.msk [vmem:[#allocation5 + $0x60] sm:$0xff] %vm727_vm2, %v1503_v25  ;;  %v1504_v37 = vadd.f32 %v1479_v30, %v1319_v51  ;;  %v1554_v48 = vld [vmem:[#allocation5 + $0x58] sm:$0xff] (!%p2141_p12)  ;;  %v1548_v30 = vld [vmem:[#allocation5 + $0x28] sm:$0xff] (!%p2141_p12) }
 0x535   : > { %1522 = vst.msk [vmem:[#allocation5 + $0x78] sm:$0xff] %vm727_vm2, %v1506_v63  ;;  %1623 = vperm.xlu0 (!%p2141_p12), %2589, %v2620_v28   ;;  %v1552_v7 = vld [vmem:[#allocation5 + $0x48] sm:$0xff] (!%p2141_p12)  ;;  %v1859_v28 = vld [vmem:[%s3367_s24 + $0x10] sm:$0xff] (!%p2141_p12) }
 0x536   : > { %1520 = vst.msk [vmem:[#allocation5 + $0x68] sm:$0xff] %vm727_vm2, %v1504_v37  ;;  %1668 = vperm.xlu1 (!%p2141_p12), %2590, %v2622_v52   ;;  %v1547_v37 = vld [vmem:[#allocation5 + $0x20] sm:$0xff] (!%p2141_p12) }
 0x539   : > { %1663 = vperm.xlu0 %2589, %v2624_v5  }
 0x53a   : > { %v1557_v4 = vld [vmem:[#allocation5 + $0x70] sm:$0xff] }
 0x53b   : > { %v1555_v49 = vld [vmem:[#allocation5 + $0x60] sm:$0xff] }
 0x53c   : > { %v1558_v38 = vld [vmem:[#allocation5 + $0x78] sm:$0xff] }
 0x53d   : > { %v1556_v56 = vld [vmem:[#allocation5 + $0x68] sm:$0xff] }
 0x594   : > { %v1634_v55 = vpop.permute.xlu1 %1633 }
 0x595   : > { %v1679_v9 = vmul.f32 %v1634_v55, %v1551_v60 }
 0x59c   : > { %v1594_v35 = vpop.permute.xlu0 %1593 }
 0x59d   : > { %v1639_v16 = vpop.permute.xlu1 %1638  ;;  %v1671_v12 = vmul.f32 %v1594_v35, %v1543_v26  ;;  %v1857_v35 = vld [vmem:[%s3367_s24] sm:$0xff] }
 0x59e   : > { %v1680_v40 = vmul.f32 %v1639_v16, %v1552_v7 }
 0x5a0   : > { %v1599_v10 = vpop.permute.xlu0 %1598  ;;  %v1691_v59 = vpack.c.bf16 %v1680_v40, %v1679_v9 }
 0x5a1   : > { %v1672_v39 = vmul.f32 %v1599_v10, %v1544_v6  ;;  %v1609_v57 = vpop.permute.xlu1 %1608  ;;  %v1860_v6 = vld [vmem:[%s3367_s24 + $0x18] sm:$0xff] }
 0x5a2   : > { %v1674_v36 = vmul.f32 %v1609_v57, %v1546_v58  ;;  %2307 = vmatprep.mubr.msk.bf16.mxu1 %vm727_vm2, %v1691_v59  ;;  %v1867_v57 = vld [vmem:[%s3367_s24 + $0x50] sm:$0xff] }
 0x5a3   : > { %v1687_v14 = vpack.c.bf16 %v1672_v39, %v1671_v12  ;;  %v1858_v12 = vld [vmem:[%s3367_s24 + $0x8] sm:$0xff] }
 0x5a4   : > { %v1604_v47 = vpop.permute.xlu0 %1603 }
 0x5a5   : > { %v1673_v29 = vmul.f32 %v1604_v47, %v1545_v50  ;;  %2299 = vmatprep.mubr.msk.bf16.mxu0 %vm727_vm2, %v1687_v14  ;;  %v1649_v51 = vpop.permute.xlu1 %1648 }
 0x5a6   : > { %v1682_v25 = vmul.f32 %v1649_v51, %v1554_v48  ;;  %v1865_v48 = vld [vmem:[%s3367_s24 + $0x40] sm:$0xff] }
 0x5a7   : > { %v1688_v45 = vpack.c.bf16 %v1674_v36, %v1673_v29 }
 0x5a8   : > { %v1644_v34 = vpop.permute.xlu0 %1643 }
 0x5a9   : > { %v1681_v63 = vmul.f32 %v1644_v34, %v1553_v23  ;;  %2300 = vmatmul.mubr.msk.bf16.vlgmr.msra.gmra.mrb[0].mxu0 %vm727_vm2, %v1688_v45  ;;  %v1619_v3 = vpop.permute.xlu1 %1618  ;;  %v1868_v34 = vld [vmem:[%s3367_s24 + $0x58] sm:$0xff] }
 0x5aa   : > { %v1676_v15 = vmul.f32 %v1619_v3, %v1548_v30 }
 0x5ab   : > { %v1692_v41 = vpack.c.bf16 %v1682_v25, %v1681_v63 }
 0x5ac   : > { %v1614_v62 = vpop.permute.xlu0 %1613 }
 0x5ad   : > { %v1675_v31 = vmul.f32 %v1614_v62, %v1547_v37  ;;  %2308 = vmatmul.mubr.msk.bf16.vlgmr.msra.gmra.mrb[0].mxu1 %vm727_vm2, %v1692_v41  ;;  %v1659_v19 = vpop.permute.xlu1 %1658  ;;  %v1866_v41 = vld [vmem:[%s3367_s24 + $0x48] sm:$0xff] }
 0x5ae   : > { %v1684_v44 = vmul.f32 %v1659_v19, %v1556_v56  ;;  %v1863_v19 = vld [vmem:[%s3367_s24 + $0x30] sm:$0xff] }
 0x5af   : > { %v1689_v61 = vpack.c.bf16 %v1676_v15, %v1675_v31 }
 0x5b0   : > { %v1654_v1 = vpop.permute.xlu0 %1653 }
 0x5b1   : > { %v1683_v43 = vmul.f32 %v1654_v1, %v1555_v49  ;;  %2303 = vmatprep.mubr.msk.bf16.mxu0 %vm727_vm2, %v1689_v61  ;;  %v1629_v2 = vpop.permute.xlu1 %1628 }
 0x5b2   : > { %v1678_v53 = vmul.f32 %v1629_v2, %v1550_v13  ;;  %v1861_v13 = vld [vmem:[%s3367_s24 + $0x20] sm:$0xff] }
 0x5b3   : > { %v1693_v27 = vpack.c.bf16 %v1684_v44, %v1683_v43 }
 0x5b4   : > { %v1624_v17 = vpop.permute.xlu0 %1623 }
 0x5b5   : > { %v1677_v32 = vmul.f32 %v1624_v17, %v1549_v46  ;;  %2311 = vmatprep.mubr.msk.bf16.mxu1 %vm727_vm2, %v1693_v27  ;;  %v1669_v11 = vpop.permute.xlu1 %1668 }
 0x5b6   : > { %v1686_v8 = vmul.f32 %v1669_v11, %v1558_v38 }
 0x5b7   : > { %v1690_v42 = vpack.c.bf16 %v1678_v53, %v1677_v32  ;;  %v1864_v53 = vld [vmem:[%s3367_s24 + $0x38] sm:$0xff] }
 0x5b8   : > { %v1664_v33 = vpop.permute.xlu0 %1663 }
 0x5b9   : > { %v1685_v20 = vmul.f32 %v1664_v33, %v1557_v4  ;;  %2304 = vmatmul.mubr.msk.bf16.gmra.mrb[4].mxu0 %vm727_vm2, %v1690_v42  ;;  %v1862_v42 = vld [vmem:[%s3367_s24 + $0x28] sm:$0xff] }
 0x5bb   : > { %v1694_v24 = vpack.c.bf16 %v1686_v8, %v1685_v20 }
 0x5bd   : > { %2312 = vmatmul.mubr.msk.bf16.gmra.mrb[4].mxu1 %vm727_vm2, %v1694_v24  ;;  %v1871_v24 = vld [vmem:[%s3367_s24 + $0x70] sm:$0xff] }
 0x67c   : > { %v2301_v18 = vpop.f32.mrb[0].mxu0 }
 0x67d   : > { %v1785_v21 = vadd.f32 %v2301_v18, %v3899_v22  ;;  %v1776_v54 = vpop.f32.mrb[1].mxu0 }
 0x67e   : > { %v1777_v52 = vadd.f32 %v3899_v22, %v1776_v54  ;;  %v2302_v5 = vpop.f32.mrb[2].mxu0 }
 0x67f   : > { %v1843_v55 = vmul.f32 %v3901_v0, %v1785_v21  ;;  %v1788_v60 = vadd.f32 %v2302_v5, %v3899_v22  ;;  %v1779_v7 = vpop.f32.mrb[3].mxu0 }
 0x680   : > { %v1841_v26 = vmul.f32 %v3901_v0, %v1777_v52  ;;  %v1780_v16 = vadd.f32 %v3899_v22, %v1779_v7  ;;  %v2309_v9 = vpop.f32.mrb[0].mxu1  ;;  %v1869_v52 = vld [vmem:[%s3367_s24 + $0x60] sm:$0xff]  ;;  %v1872_v7 = vld [vmem:[%s3367_s24 + $0x78] sm:$0xff] }
 0x681   : > { %v1875_v40 = vadd.f32 %v1859_v28, %v1843_v55  ;;  %v1844_v10 = vmul.f32 %v3901_v0, %v1788_v60  ;;  %v1817_v39 = vadd.f32 %v2309_v9, %v3899_v22  ;;  %v1808_v58 = vpop.f32.mrb[1].mxu1  ;;  %v1870_v9 = vld [vmem:[%s3367_s24 + $0x68] sm:$0xff] }
 0x682   : > { %v1873_v50 = vadd.f32 %v1857_v35, %v1841_v26  ;;  %v1842_v59 = vmul.f32 %v3901_v0, %v1780_v16  ;;  %v1809_v14 = vadd.f32 %v3899_v22, %v1808_v58  ;;  %v2310_v36 = vpop.f32.mrb[2].mxu1 }
 0x683   : > { %1891 = vst.msk [vmem:[%s3393_s9 + $0x10] sm:$0xff] %vm727_vm2, %v1875_v40  ;;  %v1876_v47 = vadd.f32 %v1860_v6, %v1844_v10  ;;  %v1851_v29 = vmul.f32 %v3901_v0, %v1817_v39  ;;  %v1820_v23 = vadd.f32 %v2310_v36, %v3899_v22  ;;  %v1811_v45 = vpop.f32.mrb[3].mxu1 }
 0x684   : > { %1889 = vst.msk [vmem:[%s3393_s9] sm:$0xff] %vm727_vm2, %v1873_v50  ;;  %v1874_v51 = vadd.f32 %v1858_v12, %v1842_v59  ;;  %v1849_v25 = vmul.f32 %v3901_v0, %v1809_v14  ;;  %v1812_v63 = vadd.f32 %v3899_v22, %v1811_v45 }
 0x685   : > { %1892 = vst.msk [vmem:[%s3393_s9 + $0x18] sm:$0xff] %vm727_vm2, %v1876_v47  ;;  %v1883_v30 = vadd.f32 %v1867_v57, %v1851_v29  ;;  %v1852_v37 = vmul.f32 %v3901_v0, %v1820_v23 }
 0x686   : > { %1890 = vst.msk [vmem:[%s3393_s9 + $0x8] sm:$0xff] %vm727_vm2, %v1874_v51  ;;  %v1881_v3 = vadd.f32 %v1865_v48, %v1849_v25  ;;  %v1850_v15 = vmul.f32 %v3901_v0, %v1812_v63 }
 0x687   : > { %1899 = vst.msk [vmem:[%s3393_s9 + $0x50] sm:$0xff] %vm727_vm2, %v1883_v30  ;;  %v1884_v62 = vadd.f32 %v1868_v34, %v1852_v37 }
 0x688   : > { %1897 = vst.msk [vmem:[%s3393_s9 + $0x40] sm:$0xff] %vm727_vm2, %v1881_v3  ;;  %v1882_v31 = vadd.f32 %v1866_v41, %v1850_v15 }
 0x689   : > { %1900 = vst.msk [vmem:[%s3393_s9 + $0x58] sm:$0xff] %vm727_vm2, %v1884_v62 }
 0x68a   : > { %1898 = vst.msk [vmem:[%s3393_s9 + $0x48] sm:$0xff] %vm727_vm2, %v1882_v31 }
 0x68c   : > { %v2305_v56 = vpop.f32.mrb[4].mxu0 }
 0x68d   : > { %v1801_v49 = vadd.f32 %v2305_v56, %v3899_v22  ;;  %v1792_v61 = vpop.f32.mrb[5].mxu0 }
 0x68e   : > { %v1793_v44 = vadd.f32 %v3899_v22, %v1792_v61  ;;  %v2306_v1 = vpop.f32.mrb[6].mxu0 }
 0x68f   : > { %v1847_v43 = vmul.f32 %v3901_v0, %v1801_v49  ;;  %v1804_v46 = vadd.f32 %v2306_v1, %v3899_v22  ;;  %v1795_v27 = vpop.f32.mrb[7].mxu0 }
 0x690   : > { %v1845_v2 = vmul.f32 %v3901_v0, %v1793_v44  ;;  %v1796_v17 = vadd.f32 %v3899_v22, %v1795_v27  ;;  %v2313_v32 = vpop.f32.mrb[4].mxu1 }
 0x691   : > { %v1879_v38 = vadd.f32 %v1863_v19, %v1847_v43  ;;  %v1848_v4 = vmul.f32 %v3901_v0, %v1804_v46  ;;  %v1833_v11 = vadd.f32 %v2313_v32, %v3899_v22  ;;  %v1824_v8 = vpop.f32.mrb[5].mxu1 }
 0x692   : > { %v1877_v33 = vadd.f32 %v1861_v13, %v1845_v2  ;;  %v1846_v20 = vmul.f32 %v3901_v0, %v1796_v17  ;;  %v1825_v18 = vadd.f32 %v3899_v22, %v1824_v8  ;;  %v2314_v21 = vpop.f32.mrb[6].mxu1 }
 0x693   : > { %1895 = vst.msk [vmem:[%s3393_s9 + $0x30] sm:$0xff] %vm727_vm2, %v1879_v38  ;;  %v1880_v54 = vadd.f32 %v1864_v53, %v1848_v4  ;;  %v1855_v28 = vmul.f32 %v3901_v0, %v1833_v11  ;;  %v1836_v5 = vadd.f32 %v2314_v21, %v3899_v22  ;;  %v1827_v55 = vpop.f32.mrb[7].mxu1 }
 0x694   : > { %1893 = vst.msk [vmem:[%s3393_s9 + $0x20] sm:$0xff] %vm727_vm2, %v1877_v33  ;;  %v1878_v35 = vadd.f32 %v1862_v42, %v1846_v20  ;;  %v1853_v60 = vmul.f32 %v3901_v0, %v1825_v18  ;;  %v1828_v26 = vadd.f32 %v3899_v22, %v1827_v55 }
 0x695   : > { %1896 = vst.msk [vmem:[%s3393_s9 + $0x38] sm:$0xff] %vm727_vm2, %v1880_v54  ;;  %v1887_v6 = vadd.f32 %v1871_v24, %v1855_v28  ;;  %v1856_v16 = vmul.f32 %v3901_v0, %v1836_v5 }
 0x696   : > { %1894 = vst.msk [vmem:[%s3393_s9 + $0x28] sm:$0xff] %vm727_vm2, %v1878_v35  ;;  %v1885_v40 = vadd.f32 %v1869_v52, %v1853_v60  ;;  %v1854_v10 = vmul.f32 %v3901_v0, %v1828_v26 }
 0x697   : > { %1903 = vst.msk [vmem:[%s3393_s9 + $0x70] sm:$0xff] %vm727_vm2, %v1887_v6  ;;  %v1888_v12 = vadd.f32 %v1872_v7, %v1856_v16 }
 0x698   : > { %1901 = vst.msk [vmem:[%s3393_s9 + $0x60] sm:$0xff] %vm727_vm2, %v1885_v40  ;;  %v1886_v39 = vadd.f32 %v1870_v9, %v1854_v10 }
 0x699   : > { %1904 = vst.msk [vmem:[%s3393_s9 + $0x78] sm:$0xff] %vm727_vm2, %v1888_v12 }
 0x69a   : > { %1902 = vst.msk [vmem:[%s3393_s9 + $0x68] sm:$0xff] %vm727_vm2, %v1886_v39 }
 0x69b PF: > { %s4148_s4 = sld [smem:[#allocation27_spill]]  ;;  %s4149_s0 = sld [smem:[#allocation28_spill]] }
 0x69c   : > { %s4150_s29 = sld [smem:[#allocation34_spill]]  ;;  %s1921_s18 = sshll.u32 %s3393_s9, 4  ;;  %s3986_s18 = int_to_ptr.vmem [resolvable:$true] %s1921_s18 }
 0x69d   : > { %s4151_s23 = sld [smem:[#allocation41_spill]]  ;;  %s1906_s1 = scalar_lea.sflag [#allocation9], %s3363_s5 }
 0x69e   : > { %s2797_s25 = scalar_lea.vmem %s3986_s18, 2048  ;;  %s2967_s15 = smov [#allocation18]  }
 0x69f   : > { %p2798_p5 = scmp.ne.s32.totalorder %s3986_s18, %s2797_s25  ;;  %s2801_s9 = sshll.u32 %s2967_s15, 4  ;;  %s2802_s9 = int_to_ptr.vmem [resolvable:$false] %s2801_s9 }
 0x6a0   : > { %s2803_s20 = scalar_lea.vmem %s2802_s9, 4096  ;;  %p2804_p10 = scmp.lt.s32.totalorder %s3986_s18, %s2802_s9 }
 0x6a1   : > { %s2154_s21 = sshll.u32 %s4148_s4, 4  ;;  %s2155_s3 = sshll.u32 %s4149_s0, 5 }
 0x6a2   : > { %s1918_s24 = sadd.s32 %s2155_s3, %s2154_s21  ;;  %p4152_p0 = scmp.ne.s32.totalorder %s4150_s29, 0 }
 0x6a3   : > { %s2156_s22 = sshll.u32 %s1918_s24, 7  ;;  %p2805_p6 = scmp.lt.s32.totalorder %s2803_s20, %s2797_s25 }
 0x6a4   : > { %s3991_s19 = scalar_lea.hbm %s4151_s23, %s2156_s22  ;;  %p2799_p3 = pnand %p2798_p5, %p4152_p0 }
 0x6a5   : > { %p2806_p9 = por %p2805_p6, %p2804_p10 }
 0x6a6   : > { %p2800_p4 = pneg %p2799_p3 }
 0x6a8   : > { %p2807_p2 = pnand %p2806_p9, %p2800_p4 }
 0x6aa   : > { %2810 = shalt.err (!%p2807_p2)
}
 0x6ab   : > { %s2811_s10 = scalar_lea.hbm %s3991_s19, 2048  ;;  %s2815_s21 = scalar_lea.hbm %s4151_s23, 8192 }
 0x6ac   : > { %p2812_p11 = scmp.ne.s32.totalorder %s3991_s19, %s2811_s10  ;;  %p2816_p1 = scmp.lt.u32.totalorder %s3991_s19, %s4151_s23 }
 0x6ad   : > { %p2817_p8 = scmp.lt.u32.totalorder %s2815_s21, %s2811_s10  ;;  %p2819_p5 = scmp.lt.u32.totalorder %s2811_s10, %s3991_s19 }
 0x6ae   : > { %p2813_p13 = pnand %p2812_p11, %p4152_p0 }
 0x6af   : > { %p2818_p12 = por %p2817_p8, %p2816_p1 }
 0x6b0   : > { %p2814_p7 = pneg %p2813_p13 }
 0x6b1   : > { %p2820_p3 = por %p2819_p5, %p2818_p12 }
 0x6b3   : > { %p2821_p4 = pnand %p2820_p3, %p2814_p7 }
 0x6b5   : > { %2824 = shalt.err (!%p2821_p4)
}
 0x6b6   : > { %s2968_s22 = smov 128   ;;  %s2969_s7 = smov 8  }
 0x6b7   : > { %2351 = dma.vmem_to_hbm [thread:$0]  (%p4152_p0), %s3986_s18, 2048, %s3991_s19, %s1906_s1, %s2968_s22, %s2968_s22, %s2969_s7  }
 0x6b8 PF: > { %s4153_s16 = sld [smem:[#allocation25_spill]]  ;;  %p2386_p10 = scmp.ge.s32.totalorder %s2951_s14, 2 }
 0x6b9   : > { %p4154_p6 = scmp.ne.s32.totalorder %s4128_s17, 0 }
 0x6bb   : > { %p2374_p9 = pnand %p2386_p10, %p4154_p6 }
 0x6be   : > { %s1936_s25 = sand.u32 1, %s4153_s16  }
 0x6bf   : > { %s1937_s15 = scalar_lea.sflag [#allocation9], %s1936_s25 }
 0x6c0   : > { %2898 = dma.done.wait (!%p2374_p9), %s1937_s15, 2048  }
 0x6c1   : > { %2900 = vsyncadd (!%p2374_p9), %s1937_s15, 4294965248  ;;  %s29_s14 = sadd.s32 1, %s2951_s14   ;;  %s4156_s5 = smov %s3310_s26 }
 0x6c2   : > { %p4022_p2 = scmp.ge.s32.totalorder %s29_s14, 10   ;;  %s4157_s17 = sld [smem:[#allocation32_spill]] }
 0x6c3   : > { %s4158_s18 = sld [smem:[#allocation33_spill]]  ;;  %s4159_s19 = sld [smem:[#allocation35_spill]] }
 0x6c4   : > { %s4161_s26 = smov %s2907_s27  ;;  %s4162_s27 = smov %s2911_s28 }
 0x6c5   : > { %s4163_s28 = smov %s4156_s5  ;;  %s4164_s29 = smov %s2919_s30 }
 0x6c6   : > { %s4165_s30 = smov %s2923_s8  ;;  %s4166_s8 = smov %s3253_s6 }
 0x6c7   : > { %s4167_s0 = smov %s2939_s11  ;;  %s4168_s9 = smov %s2943_s12 }
 0x6c8   : > { %s4169_s10 = smov %s2947_s13  ;;  %s4170_s11 = smov %s4157_s17 }
 0x6c9   : > { %s4171_s12 = smov %s4158_s18  ;;  %s4172_s13 = smov %s4159_s19 }
 0x6ca   :  { %28 = sbr.rel (!%p4022_p2) target bundleno = 22 (0x16), region = 130 }
 0x6d1   :  { %1942 = vsyncpa [#allocation8], 1 }
 0x6d2   :  { %1944 = vsyncpa [#allocation8 + $0x1], 1 }
 0x6d3   :  { %1945 = vsyncpa [#allocation11], 1 }
 0x6d4   :  { %1947 = vsyncpa [#allocation11 + $0x1], 1 }
 0x6d5   :  { %1948 = vsyncpa [#allocation14], 1 }
 0x6d6   :  { %1949 = vsyncpa [#allocation17], 1 }
 0x6d7   :  { %1950 = vsyncpa [#allocation9], 1 }
 0x6d8   :  { %1952 = vsyncpa [#allocation9 + $0x1], 1 }

</bundles_post_ra>
